<compile_context>
chip_gen: v5e
topology: v5e:2x2
jax: 0.10.0
libtpu: 0.0.40
codegen_flags: <defaults>
</compile_context>

<pallas_src>
import jax
import jax.numpy as jnp
from jax.experimental import pallas as pl
from jax.experimental.pallas import tpu as pltpu

EPS = 1e-5
F_IN, F1, F2, F3, F_OUT = 26, 32, 16, 8, 1


def _make_kernel(batch, tile_b):
    inv_n = 1.0 / float(batch)

    def kernel(x_ref, w1_ref, w2_ref, w3_ref, w4t_ref,
               gb1_ref, gb2_ref, gb3_ref, b4_ref,
               y_ref,
               s1_ref, s2_ref, scale_ref, shift_ref):
        p = pl.program_id(0)            # phase (0..3), outer / slow axis
        t = pl.program_id(1)            # batch tile, inner / fast axis
        nt = pl.num_programs(1)

        # lane (= batch) mask for padded rows beyond the true batch size
        col = t * tile_b + jax.lax.broadcasted_iota(jnp.int32, (1, tile_b), 1)
        valid = col < batch             # (1, TB)

        gb_refs = (gb1_ref, gb2_ref, gb3_ref)

        def fc1():                      # (F1, TB) = W1 @ x_tile^T  (trans_b)
            return jax.lax.dot_general(
                w1_ref[...], x_ref[...],
                dimension_numbers=(((1,), (1,)), ((), ())),
                preferred_element_type=jnp.float32)

        def lin(w_ref, a):              # (Fout, Fin) @ (Fin, TB)
            return jnp.dot(w_ref[...], a, preferred_element_type=jnp.float32)

        def bn_relu(h, layer):          # folded BN as scale/shift FMA + ReLU
            f = h.shape[0]
            sc = scale_ref[layer, 0:f, :]
            sh = shift_ref[layer, 0:f, :]
            return jnp.maximum(h * sc + sh, 0.0)

        def accumulate_stats(h, layer):  # h: (F, TB) pre-BN activations
            f = h.shape[0]
            hm = jnp.where(valid, h, 0.0)

            @pl.when(t == 0)
            def _():
                s1_ref[layer, 0:f, :] = jnp.zeros((f, 1), jnp.float32)
                s2_ref[layer, 0:f, :] = jnp.zeros((f, 1), jnp.float32)

            s1_ref[layer, 0:f, :] += jnp.sum(hm, axis=1, keepdims=True)
            s2_ref[layer, 0:f, :] += jnp.sum(hm * hm, axis=1, keepdims=True)

            @pl.when(t == nt - 1)        # finalize -> fold BN to scale/shift
            def _():
                gb = gb_refs[layer][...]                 # (f, 2) = [gamma, beta]
                gamma, beta = gb[:, 0:1], gb[:, 1:2]
                mu = s1_ref[layer, 0:f, :] * inv_n
                var = s2_ref[layer, 0:f, :] * inv_n - mu * mu
                sc = gamma * jax.lax.rsqrt(var + EPS)
                scale_ref[layer, 0:f, :] = sc
                shift_ref[layer, 0:f, :] = beta - mu * sc

        # Output blocks are revisited across phases (non-consecutively); keep
        # every visit fully written so only the phase-3 values survive.
        @pl.when(p < 3)
        def _():
            y_ref[...] = jnp.zeros(y_ref.shape, y_ref.dtype)

        @pl.when(p == 0)
        def _():
            accumulate_stats(fc1(), 0)

        @pl.when(p == 1)
        def _():
            a1 = bn_relu(fc1(), 0)
            accumulate_stats(lin(w2_ref, a1), 1)

        @pl.when(p == 2)
        def _():
            a1 = bn_relu(fc1(), 0)
            a2 = bn_relu(lin(w2_ref, a1), 1)
            accumulate_stats(lin(w3_ref, a2), 2)

        @pl.when(p == 3)
        def _():
            a1 = bn_relu(fc1(), 0)
            a2 = bn_relu(lin(w2_ref, a1), 1)
            a3 = bn_relu(lin(w3_ref, a2), 2)
            # final 8->1 layer: VPU multiply + sublane reduce (no N=1 MXU pass)
            y = jnp.sum(w4t_ref[...] * a3, axis=0, keepdims=True) + b4_ref[...]
            y_ref[...] = y.astype(y_ref.dtype)

    return kernel


def netap_forward(x, params, *, tile_b=128):
    """x: (B, 26) float32. params: PyTorch-shaped weights. Returns (B, 1)."""
    B = x.shape[0]
    n_tiles = max(1, -(-B // tile_b))
    Bp = n_tiles * tile_b

    x_pad = jnp.zeros((Bp, F_IN), jnp.float32).at[:B, :].set(
        x.astype(jnp.float32))

    def gb(i):                           # pack (gamma, beta) -> (F, 2)
        return jnp.stack([jnp.asarray(params[f"g{i}"], jnp.float32),
                          jnp.asarray(params[f"be{i}"], jnp.float32)], axis=1)

    w1 = jnp.asarray(params["w1"], jnp.float32)                    # (32, 26)
    w2 = jnp.asarray(params["w2"], jnp.float32)                    # (16, 32)
    w3 = jnp.asarray(params["w3"], jnp.float32)                    # (8, 16)
    w4t = jnp.asarray(params["w4"], jnp.float32).reshape(F3, 1)    # (8, 1)
    b4 = jnp.asarray(params["b4"], jnp.float32).reshape(1, 1)
    # NOTE: fc1/fc2/fc3 biases are intentionally not passed -- a bias feeding
    # straight into training-mode BatchNorm cancels exactly.

    args = (x_pad, w1, w2, w3, w4t, gb(1), gb(2), gb(3), b4)

    def const(shape):
        return pl.BlockSpec(shape, lambda p, t: (0, 0))

    in_specs = [
        pl.BlockSpec((tile_b, F_IN), lambda p, t: (t, 0)),   # x: batch-tiled
        const((F1, F_IN)), const((F2, F1)), const((F3, F2)),  # w1, w2, w3
        const((F3, 1)),                                       # w4^T
        const((F1, 2)), const((F2, 2)), const((F3, 2)),       # packed (gamma,beta)
        const((1, 1)),                                        # b4
    ]
    out_specs = pl.BlockSpec((1, tile_b), lambda p, t: (0, t))  # lane-dense row

    y_row = pl.pallas_call(
        _make_kernel(B, tile_b),
        out_shape=jax.ShapeDtypeStruct((1, Bp), jnp.float32),
        grid_spec=pltpu.PrefetchScalarGridSpec(
            num_scalar_prefetch=0,
            grid=(4, n_tiles),            # (phase, batch tile); tile is inner
            in_specs=in_specs,
            out_specs=out_specs,
            scratch_shapes=[pltpu.VMEM((3, F1, 1), jnp.float32)   # sum
                            for _ in range(4)],                   # sumsq/scale/shift
        ),
        compiler_params=pltpu.CompilerParams(
            # both axes carry sequential state (stats accumulation, phases)
            dimension_semantics=("arbitrary", "arbitrary")),
    )(*args)

    return y_row[0, :B].reshape(B, 1)


def init_params(key):
    """Deterministic synthetic parameters with PyTorch Linear/BatchNorm shapes."""
    layers = [F_IN, F1, F2, F3, F_OUT]
    ks = jax.random.split(key, 8)
    params = {}
    for i, (fin, fout) in enumerate(zip(layers[:-1], layers[1:]), start=1):
        bound = 1.0 / jnp.sqrt(fin)
        params[f"w{i}"] = jax.random.uniform(ks[2 * (i - 1)], (fout, fin),
                                             jnp.float32, -bound, bound)
        params[f"b{i}"] = jax.random.uniform(ks[2 * (i - 1) + 1], (fout,),
                                             jnp.float32, -bound, bound)
        if i <= 3:  # BatchNorm affine params (gamma=1, beta=0 at init)
            params[f"g{i}"] = jnp.ones((fout,), jnp.float32)
            params[f"be{i}"] = jnp.zeros((fout,), jnp.float32)
    return params


def netap_reference(x, params):
    """Pure-JAX reference of the PyTorch forward (training-mode BN, with biases)."""
    h = x
    for i in (1, 2, 3):
        h = h @ params[f"w{i}"].T + params[f"b{i}"]
        mu = jnp.mean(h, axis=0, keepdims=True)
        var = jnp.mean((h - mu) ** 2, axis=0, keepdims=True)
        h = (h - mu) / jnp.sqrt(var + EPS)
        h = jnp.maximum(h * params[f"g{i}"] + params[f"be{i}"], 0.0)
    return h @ params["w4"].T + params["b4"]


if __name__ == "__main__":
    key = jax.random.PRNGKey(0)
    k_x, k_p = jax.random.split(key)

    B = 200  # 2 batch tiles of 128; last tile has 56 padded rows (masked)
    x = jax.random.normal(k_x, (B, F_IN), jnp.float32)
    params = init_params(k_p)

    y = jax.block_until_ready(netap_forward(x, params))

    y_ref = netap_reference(x, params)
    assert y.shape == (B, 1), y.shape
    max_err = float(jnp.max(jnp.abs(y - y_ref)))
    assert jnp.allclose(y, y_ref, atol=1e-4, rtol=1e-4), (
        f"mismatch: max abs err {max_err}")

    print("KERNEL_OK")
</pallas_src>

<mosaic_0001>
module attributes {stable_mosaic.version = 11 : i64} {
  func.func @kernel(%arg0: i32, %arg1: i32, %arg2: memref<128x26xf32, #tpu.memory_space<vmem>>, %arg3: memref<32x26xf32, #tpu.memory_space<vmem>>, %arg4: memref<16x32xf32, #tpu.memory_space<vmem>>, %arg5: memref<8x16xf32, #tpu.memory_space<vmem>>, %arg6: memref<8x1xf32, #tpu.memory_space<vmem>>, %arg7: memref<32x2xf32, #tpu.memory_space<vmem>>, %arg8: memref<16x2xf32, #tpu.memory_space<vmem>>, %arg9: memref<8x2xf32, #tpu.memory_space<vmem>>, %arg10: memref<1x1xf32, #tpu.memory_space<vmem>>, %arg11: memref<1x128xf32, #tpu.memory_space<vmem>>, %arg12: memref<3x32x1xf32, #tpu.memory_space<vmem>>, %arg13: memref<3x32x1xf32, #tpu.memory_space<vmem>>, %arg14: memref<3x32x1xf32, #tpu.memory_space<vmem>>, %arg15: memref<3x32x1xf32, #tpu.memory_space<vmem>>) attributes {dimension_semantics = [#tpu.dimension_semantics<arbitrary>, #tpu.dimension_semantics<arbitrary>], iteration_bounds = array<i64: 4, 2>, scalar_prefetch = 0 : i64, scratch_operands = 4 : i64, tpu.core_type = #tpu.core_type<tc>, window_params = [{transform_indices = @transform_0, window_bounds = array<i64: 128, 26>}, {pipeline_mode = #tpu.pipeline_mode<synchronous>, transform_indices = @transform_1, window_bounds = array<i64: 32, 26>}, {pipeline_mode = #tpu.pipeline_mode<synchronous>, transform_indices = @transform_2, window_bounds = array<i64: 16, 32>}, {pipeline_mode = #tpu.pipeline_mode<synchronous>, transform_indices = @transform_3, window_bounds = array<i64: 8, 16>}, {pipeline_mode = #tpu.pipeline_mode<synchronous>, transform_indices = @transform_4, window_bounds = array<i64: 8, 1>}, {pipeline_mode = #tpu.pipeline_mode<synchronous>, transform_indices = @transform_5, window_bounds = array<i64: 32, 2>}, {pipeline_mode = #tpu.pipeline_mode<synchronous>, transform_indices = @transform_6, window_bounds = array<i64: 16, 2>}, {pipeline_mode = #tpu.pipeline_mode<synchronous>, transform_indices = @transform_7, window_bounds = array<i64: 8, 2>}, {pipeline_mode = #tpu.pipeline_mode<synchronous>, transform_indices = @transform_8, window_bounds = array<i64: 1, 1>}, {transform_indices = @transform_9, window_bounds = array<i64: 1, 128>}]} {
    %c128_i32 = arith.constant 128 : i32
    %0 = arith.muli %arg1, %c128_i32 : i32
    %1 = tpu.iota {dimensions = array<i32: 1>} : vector<1x128xi32>
    %2 = vector.broadcast %0 : i32 to vector<1x128xi32>
    %3 = arith.addi %2, %1 : vector<1x128xi32>
    %c200_i32 = arith.constant 200 : i32
    %4 = vector.broadcast %c200_i32 : i32 to vector<1x128xi32>
    %5 = arith.cmpi slt, %3, %4 : vector<1x128xi32>
    %c3_i32 = arith.constant 3 : i32
    %6 = arith.cmpi slt, %arg0, %c3_i32 : i32
    %7 = arith.extui %6 : i1 to i32
    %c0_i32 = arith.constant 0 : i32
    %8 = arith.cmpi ne, %7, %c0_i32 : i32
    scf.if %8 {
      %cst = arith.constant 0.000000e+00 : f32
      %21 = vector.broadcast %cst : f32 to vector<1x128xf32>
      %c0 = arith.constant 0 : index
      %c0_6 = arith.constant 0 : index
      %22 = vector.load %arg11[%c0, %c0_6] : memref<1x128xf32, #tpu.memory_space<vmem>>, vector<1x128xf32>
      tpu.vector_store %arg11[%c0, %c0_6], %21 {strides = array<i32>} : memref<1x128xf32, #tpu.memory_space<vmem>>, vector<1x128xf32>,
    } else {
    }
    %c0_i32_0 = arith.constant 0 : i32
    %9 = arith.cmpi eq, %arg0, %c0_i32_0 : i32
    %10 = arith.extui %9 : i1 to i32
    %c0_i32_1 = arith.constant 0 : i32
    %11 = arith.cmpi ne, %10, %c0_i32_1 : i32
    scf.if %11 {
      %c0 = arith.constant 0 : index
      %c0_6 = arith.constant 0 : index
      %21 = vector.load %arg3[%c0, %c0_6] : memref<32x26xf32, #tpu.memory_space<vmem>>, vector<32x26xf32>
      %c0_7 = arith.constant 0 : index
      %c0_8 = arith.constant 0 : index
      %22 = vector.load %arg2[%c0_7, %c0_8] : memref<128x26xf32, #tpu.memory_space<vmem>>, vector<128x26xf32>
      %cst = arith.constant dense<0.000000e+00> : vector<32x128xf32>
      %23 = tpu.matmul %21, %22, %cst {dimension_numbers = #tpu.dot_dimension_numbers<[1], [1], [0], [0], [0, 0, 1, 0], [], []>} : vector<32x26xf32>, vector<128x26xf32>, vector<32x128xf32> -> vector<32x128xf32>
      %cst_9 = arith.constant 0.000000e+00 : f32
      %24 = vector.shape_cast %5 : vector<1x128xi1> to vector<1x128xi1>
      %25 = vector.broadcast %24 : vector<1x128xi1> to vector<32x128xi1>
      %26 = vector.broadcast %cst_9 : f32 to vector<32x128xf32>
      %27 = arith.select %25, %23, %26 : vector<32x128xi1>, vector<32x128xf32>
      %c0_i32_10 = arith.constant 0 : i32
      %28 = arith.cmpi eq, %arg1, %c0_i32_10 : i32
      %29 = arith.extui %28 : i1 to i32
      %c0_i32_11 = arith.constant 0 : i32
      %30 = arith.cmpi ne, %29, %c0_i32_11 : i32
      scf.if %30 {
        %cst_28 = arith.constant 0.000000e+00 : f32
        %51 = vector.broadcast %cst_28 : f32 to vector<32x1xf32>
        %c0_29 = arith.constant 0 : index
        %c0_30 = arith.constant 0 : index
        %c0_31 = arith.constant 0 : index
        %52 = vector.load %arg12[%c0_29, %c0_30, %c0_31] : memref<3x32x1xf32, #tpu.memory_space<vmem>>, vector<1x32x1xf32>
        %53 = vector.shape_cast %52 : vector<1x32x1xf32> to vector<32x1xf32>
        %54 = vector.shape_cast %51 : vector<32x1xf32> to vector<1x32x1xf32>
        tpu.vector_store %arg12[%c0_29, %c0_30, %c0_31], %54 {strides = array<i32>} : memref<3x32x1xf32, #tpu.memory_space<vmem>>, vector<1x32x1xf32>,
        %cst_32 = arith.constant 0.000000e+00 : f32
        %55 = vector.broadcast %cst_32 : f32 to vector<32x1xf32>
        %c0_33 = arith.constant 0 : index
        %c0_34 = arith.constant 0 : index
        %c0_35 = arith.constant 0 : index
        %56 = vector.load %arg13[%c0_33, %c0_34, %c0_35] : memref<3x32x1xf32, #tpu.memory_space<vmem>>, vector<1x32x1xf32>
        %57 = vector.shape_cast %56 : vector<1x32x1xf32> to vector<32x1xf32>
        %58 = vector.shape_cast %55 : vector<32x1xf32> to vector<1x32x1xf32>
        tpu.vector_store %arg13[%c0_33, %c0_34, %c0_35], %58 {strides = array<i32>} : memref<3x32x1xf32, #tpu.memory_space<vmem>>, vector<1x32x1xf32>,
      } else {
      }
      %c0_12 = arith.constant 0 : index
      %c0_13 = arith.constant 0 : index
      %c0_14 = arith.constant 0 : index
      %31 = vector.load %arg12[%c0_12, %c0_13, %c0_14] : memref<3x32x1xf32, #tpu.memory_space<vmem>>, vector<1x32x1xf32>
      %32 = vector.shape_cast %31 : vector<1x32x1xf32> to vector<32x1xf32>
      %cst_15 = arith.constant dense<0.000000e+00> : vector<32xf32>
      %33 = vector.multi_reduction <add>, %27, %cst_15 [1] : vector<32x128xf32> to vector<32xf32>
      %34 = vector.shape_cast %33 : vector<32xf32> to vector<32x1xf32>
      %35 = arith.addf %32, %34 : vector<32x1xf32>
      %c0_16 = arith.constant 0 : index
      %c0_17 = arith.constant 0 : index
      %c0_18 = arith.constant 0 : index
      %36 = vector.load %arg12[%c0_16, %c0_17, %c0_18] : memref<3x32x1xf32, #tpu.memory_space<vmem>>, vector<1x32x1xf32>
      %37 = vector.shape_cast %36 : vector<1x32x1xf32> to vector<32x1xf32>
      %38 = vector.shape_cast %35 : vector<32x1xf32> to vector<1x32x1xf32>
      tpu.vector_store %arg12[%c0_16, %c0_17, %c0_18], %38 {strides = array<i32>} : memref<3x32x1xf32, #tpu.memory_space<vmem>>, vector<1x32x1xf32>,
      %c0_19 = arith.constant 0 : index
      %c0_20 = arith.constant 0 : index
      %c0_21 = arith.constant 0 : index
      %39 = vector.load %arg13[%c0_19, %c0_20, %c0_21] : memref<3x32x1xf32, #tpu.memory_space<vmem>>, vector<1x32x1xf32>
      %40 = vector.shape_cast %39 : vector<1x32x1xf32> to vector<32x1xf32>
      %41 = arith.mulf %27, %27 : vector<32x128xf32>
      %cst_22 = arith.constant dense<0.000000e+00> : vector<32xf32>
      %42 = vector.multi_reduction <add>, %41, %cst_22 [1] : vector<32x128xf32> to vector<32xf32>
      %43 = vector.shape_cast %42 : vector<32xf32> to vector<32x1xf32>
      %44 = arith.addf %40, %43 : vector<32x1xf32>
      %c0_23 = arith.constant 0 : index
      %c0_24 = arith.constant 0 : index
      %c0_25 = arith.constant 0 : index
      %45 = vector.load %arg13[%c0_23, %c0_24, %c0_25] : memref<3x32x1xf32, #tpu.memory_space<vmem>>, vector<1x32x1xf32>
      %46 = vector.shape_cast %45 : vector<1x32x1xf32> to vector<32x1xf32>
      %47 = vector.shape_cast %44 : vector<32x1xf32> to vector<1x32x1xf32>
      tpu.vector_store %arg13[%c0_23, %c0_24, %c0_25], %47 {strides = array<i32>} : memref<3x32x1xf32, #tpu.memory_space<vmem>>, vector<1x32x1xf32>,
      %c1_i32_26 = arith.constant 1 : i32
      %48 = arith.cmpi eq, %arg1, %c1_i32_26 : i32
      %49 = arith.extui %48 : i1 to i32
      %c0_i32_27 = arith.constant 0 : i32
      %50 = arith.cmpi ne, %49, %c0_i32_27 : i32
      scf.if %50 {
        %c0_28 = arith.constant 0 : index
        %c0_29 = arith.constant 0 : index
        %51 = vector.load %arg7[%c0_28, %c0_29] : memref<32x2xf32, #tpu.memory_space<vmem>>, vector<32x2xf32>
        %52 = vector.extract_strided_slice %51 {offsets = [0, 0], sizes = [32, 1], strides = [1, 1]} : vector<32x2xf32> to vector<32x1xf32>
        %53 = vector.extract_strided_slice %51 {offsets = [0, 1], sizes = [32, 1], strides = [1, 1]} : vector<32x2xf32> to vector<32x1xf32>
        %c0_30 = arith.constant 0 : index
        %c0_31 = arith.constant 0 : index
        %c0_32 = arith.constant 0 : index
        %54 = vector.load %arg12[%c0_30, %c0_31, %c0_32] : memref<3x32x1xf32, #tpu.memory_space<vmem>>, vector<1x32x1xf32>
        %55 = vector.shape_cast %54 : vector<1x32x1xf32> to vector<32x1xf32>
        %cst_33 = arith.constant 5.000000e-03 : f32
        %56 = vector.broadcast %cst_33 : f32 to vector<32x1xf32>
        %57 = arith.mulf %55, %56 : vector<32x1xf32>
        %c0_34 = arith.constant 0 : index
        %c0_35 = arith.constant 0 : index
        %c0_36 = arith.constant 0 : index
        %58 = vector.load %arg13[%c0_34, %c0_35, %c0_36] : memref<3x32x1xf32, #tpu.memory_space<vmem>>, vector<1x32x1xf32>
        %59 = vector.shape_cast %58 : vector<1x32x1xf32> to vector<32x1xf32>
        %cst_37 = arith.constant 5.000000e-03 : f32
        %60 = vector.broadcast %cst_37 : f32 to vector<32x1xf32>
        %61 = arith.mulf %59, %60 : vector<32x1xf32>
        %62 = arith.mulf %57, %57 : vector<32x1xf32>
        %63 = arith.subf %61, %62 : vector<32x1xf32>
        %cst_38 = arith.constant 9.99999974E-6 : f32
        %64 = vector.broadcast %cst_38 : f32 to vector<32x1xf32>
        %65 = arith.addf %63, %64 : vector<32x1xf32>
        %66 = math.rsqrt %65 : vector<32x1xf32>
        %67 = arith.mulf %52, %66 : vector<32x1xf32>
        %c0_39 = arith.constant 0 : index
        %c0_40 = arith.constant 0 : index
        %c0_41 = arith.constant 0 : index
        %68 = vector.load %arg14[%c0_39, %c0_40, %c0_41] : memref<3x32x1xf32, #tpu.memory_space<vmem>>, vector<1x32x1xf32>
        %69 = vector.shape_cast %68 : vector<1x32x1xf32> to vector<32x1xf32>
        %70 = vector.shape_cast %67 : vector<32x1xf32> to vector<1x32x1xf32>
        tpu.vector_store %arg14[%c0_39, %c0_40, %c0_41], %70 {strides = array<i32>} : memref<3x32x1xf32, #tpu.memory_space<vmem>>, vector<1x32x1xf32>,
        %71 = arith.mulf %57, %67 : vector<32x1xf32>
        %72 = arith.subf %53, %71 : vector<32x1xf32>
        %c0_42 = arith.constant 0 : index
        %c0_43 = arith.constant 0 : index
        %c0_44 = arith.constant 0 : index
        %73 = vector.load %arg15[%c0_42, %c0_43, %c0_44] : memref<3x32x1xf32, #tpu.memory_space<vmem>>, vector<1x32x1xf32>
        %74 = vector.shape_cast %73 : vector<1x32x1xf32> to vector<32x1xf32>
        %75 = vector.shape_cast %72 : vector<32x1xf32> to vector<1x32x1xf32>
        tpu.vector_store %arg15[%c0_42, %c0_43, %c0_44], %75 {strides = array<i32>} : memref<3x32x1xf32, #tpu.memory_space<vmem>>, vector<1x32x1xf32>,
      } else {
      }
    } else {
    }
    %c1_i32 = arith.constant 1 : i32
    %12 = arith.cmpi eq, %arg0, %c1_i32 : i32
    %13 = arith.extui %12 : i1 to i32
    %c0_i32_2 = arith.constant 0 : i32
    %14 = arith.cmpi ne, %13, %c0_i32_2 : i32
    scf.if %14 {
      %c0 = arith.constant 0 : index
      %c0_6 = arith.constant 0 : index
      %21 = vector.load %arg3[%c0, %c0_6] : memref<32x26xf32, #tpu.memory_space<vmem>>, vector<32x26xf32>
      %c0_7 = arith.constant 0 : index
      %c0_8 = arith.constant 0 : index
      %22 = vector.load %arg2[%c0_7, %c0_8] : memref<128x26xf32, #tpu.memory_space<vmem>>, vector<128x26xf32>
      %cst = arith.constant dense<0.000000e+00> : vector<32x128xf32>
      %23 = tpu.matmul %21, %22, %cst {dimension_numbers = #tpu.dot_dimension_numbers<[1], [1], [0], [0], [0, 0, 1, 0], [], []>} : vector<32x26xf32>, vector<128x26xf32>, vector<32x128xf32> -> vector<32x128xf32>
      %c0_9 = arith.constant 0 : index
      %c0_10 = arith.constant 0 : index
      %c0_11 = arith.constant 0 : index
      %24 = vector.load %arg14[%c0_9, %c0_10, %c0_11] : memref<3x32x1xf32, #tpu.memory_space<vmem>>, vector<1x32x1xf32>
      %25 = vector.shape_cast %24 : vector<1x32x1xf32> to vector<32x1xf32>
      %c0_12 = arith.constant 0 : index
      %c0_13 = arith.constant 0 : index
      %c0_14 = arith.constant 0 : index
      %26 = vector.load %arg15[%c0_12, %c0_13, %c0_14] : memref<3x32x1xf32, #tpu.memory_space<vmem>>, vector<1x32x1xf32>
      %27 = vector.shape_cast %26 : vector<1x32x1xf32> to vector<32x1xf32>
      %28 = vector.broadcast %25 : vector<32x1xf32> to vector<32x128xf32>
      %29 = arith.mulf %23, %28 : vector<32x128xf32>
      %30 = vector.broadcast %27 : vector<32x1xf32> to vector<32x128xf32>
      %31 = arith.addf %29, %30 : vector<32x128xf32>
      %cst_15 = arith.constant 0.000000e+00 : f32
      %32 = vector.broadcast %cst_15 : f32 to vector<32x128xf32>
      %33 = arith.maximumf %31, %32 : vector<32x128xf32>
      %c0_16 = arith.constant 0 : index
      %c0_17 = arith.constant 0 : index
      %34 = vector.load %arg4[%c0_16, %c0_17] : memref<16x32xf32, #tpu.memory_space<vmem>>, vector<16x32xf32>
      %cst_18 = arith.constant dense<0.000000e+00> : vector<16x128xf32>
      %35 = tpu.matmul %34, %33, %cst_18 {dimension_numbers = #tpu.dot_dimension_numbers<[1], [0], [0], [1], [0, 0, 1, 1], [], []>} : vector<16x32xf32>, vector<32x128xf32>, vector<16x128xf32> -> vector<16x128xf32>
      %cst_19 = arith.constant 0.000000e+00 : f32
      %36 = vector.shape_cast %5 : vector<1x128xi1> to vector<1x128xi1>
      %37 = vector.broadcast %36 : vector<1x128xi1> to vector<16x128xi1>
      %38 = vector.broadcast %cst_19 : f32 to vector<16x128xf32>
      %39 = arith.select %37, %35, %38 : vector<16x128xi1>, vector<16x128xf32>
      %c0_i32_20 = arith.constant 0 : i32
      %40 = arith.cmpi eq, %arg1, %c0_i32_20 : i32
      %41 = arith.extui %40 : i1 to i32
      %c0_i32_21 = arith.constant 0 : i32
      %42 = arith.cmpi ne, %41, %c0_i32_21 : i32
      scf.if %42 {
        %cst_37 = arith.constant 0.000000e+00 : f32
        %63 = vector.broadcast %cst_37 : f32 to vector<16x1xf32>
        %c1_38 = arith.constant 1 : index
        %c0_39 = arith.constant 0 : index
        %c0_40 = arith.constant 0 : index
        %64 = vector.load %arg12[%c1_38, %c0_39, %c0_40] : memref<3x32x1xf32, #tpu.memory_space<vmem>>, vector<1x16x1xf32>
        %65 = vector.shape_cast %64 : vector<1x16x1xf32> to vector<16x1xf32>
        %66 = vector.shape_cast %63 : vector<16x1xf32> to vector<1x16x1xf32>
        tpu.vector_store %arg12[%c1_38, %c0_39, %c0_40], %66 {strides = array<i32>} : memref<3x32x1xf32, #tpu.memory_space<vmem>>, vector<1x16x1xf32>,
        %cst_41 = arith.constant 0.000000e+00 : f32
        %67 = vector.broadcast %cst_41 : f32 to vector<16x1xf32>
        %c1_42 = arith.constant 1 : index
        %c0_43 = arith.constant 0 : index
        %c0_44 = arith.constant 0 : index
        %68 = vector.load %arg13[%c1_42, %c0_43, %c0_44] : memref<3x32x1xf32, #tpu.memory_space<vmem>>, vector<1x16x1xf32>
        %69 = vector.shape_cast %68 : vector<1x16x1xf32> to vector<16x1xf32>
        %70 = vector.shape_cast %67 : vector<16x1xf32> to vector<1x16x1xf32>
        tpu.vector_store %arg13[%c1_42, %c0_43, %c0_44], %70 {strides = array<i32>} : memref<3x32x1xf32, #tpu.memory_space<vmem>>, vector<1x16x1xf32>,
      } else {
      }
      %c1 = arith.constant 1 : index
      %c0_22 = arith.constant 0 : index
      %c0_23 = arith.constant 0 : index
      %43 = vector.load %arg12[%c1, %c0_22, %c0_23] : memref<3x32x1xf32, #tpu.memory_space<vmem>>, vector<1x16x1xf32>
      %44 = vector.shape_cast %43 : vector<1x16x1xf32> to vector<16x1xf32>
      %cst_24 = arith.constant dense<0.000000e+00> : vector<16xf32>
      %45 = vector.multi_reduction <add>, %39, %cst_24 [1] : vector<16x128xf32> to vector<16xf32>
      %46 = vector.shape_cast %45 : vector<16xf32> to vector<16x1xf32>
      %47 = arith.addf %44, %46 : vector<16x1xf32>
      %c1_25 = arith.constant 1 : index
      %c0_26 = arith.constant 0 : index
      %c0_27 = arith.constant 0 : index
      %48 = vector.load %arg12[%c1_25, %c0_26, %c0_27] : memref<3x32x1xf32, #tpu.memory_space<vmem>>, vector<1x16x1xf32>
      %49 = vector.shape_cast %48 : vector<1x16x1xf32> to vector<16x1xf32>
      %50 = vector.shape_cast %47 : vector<16x1xf32> to vector<1x16x1xf32>
      tpu.vector_store %arg12[%c1_25, %c0_26, %c0_27], %50 {strides = array<i32>} : memref<3x32x1xf32, #tpu.memory_space<vmem>>, vector<1x16x1xf32>,
      %c1_28 = arith.constant 1 : index
      %c0_29 = arith.constant 0 : index
      %c0_30 = arith.constant 0 : index
      %51 = vector.load %arg13[%c1_28, %c0_29, %c0_30] : memref<3x32x1xf32, #tpu.memory_space<vmem>>, vector<1x16x1xf32>
      %52 = vector.shape_cast %51 : vector<1x16x1xf32> to vector<16x1xf32>
      %53 = arith.mulf %39, %39 : vector<16x128xf32>
      %cst_31 = arith.constant dense<0.000000e+00> : vector<16xf32>
      %54 = vector.multi_reduction <add>, %53, %cst_31 [1] : vector<16x128xf32> to vector<16xf32>
      %55 = vector.shape_cast %54 : vector<16xf32> to vector<16x1xf32>
      %56 = arith.addf %52, %55 : vector<16x1xf32>
      %c1_32 = arith.constant 1 : index
      %c0_33 = arith.constant 0 : index
      %c0_34 = arith.constant 0 : index
      %57 = vector.load %arg13[%c1_32, %c0_33, %c0_34] : memref<3x32x1xf32, #tpu.memory_space<vmem>>, vector<1x16x1xf32>
      %58 = vector.shape_cast %57 : vector<1x16x1xf32> to vector<16x1xf32>
      %59 = vector.shape_cast %56 : vector<16x1xf32> to vector<1x16x1xf32>
      tpu.vector_store %arg13[%c1_32, %c0_33, %c0_34], %59 {strides = array<i32>} : memref<3x32x1xf32, #tpu.memory_space<vmem>>, vector<1x16x1xf32>,
      %c1_i32_35 = arith.constant 1 : i32
      %60 = arith.cmpi eq, %arg1, %c1_i32_35 : i32
      %61 = arith.extui %60 : i1 to i32
      %c0_i32_36 = arith.constant 0 : i32
      %62 = arith.cmpi ne, %61, %c0_i32_36 : i32
      scf.if %62 {
        %c0_37 = arith.constant 0 : index
        %c0_38 = arith.constant 0 : index
        %63 = vector.load %arg8[%c0_37, %c0_38] : memref<16x2xf32, #tpu.memory_space<vmem>>, vector<16x2xf32>
        %64 = vector.extract_strided_slice %63 {offsets = [0, 0], sizes = [16, 1], strides = [1, 1]} : vector<16x2xf32> to vector<16x1xf32>
        %65 = vector.extract_strided_slice %63 {offsets = [0, 1], sizes = [16, 1], strides = [1, 1]} : vector<16x2xf32> to vector<16x1xf32>
        %c1_39 = arith.constant 1 : index
        %c0_40 = arith.constant 0 : index
        %c0_41 = arith.constant 0 : index
        %66 = vector.load %arg12[%c1_39, %c0_40, %c0_41] : memref<3x32x1xf32, #tpu.memory_space<vmem>>, vector<1x16x1xf32>
        %67 = vector.shape_cast %66 : vector<1x16x1xf32> to vector<16x1xf32>
        %cst_42 = arith.constant 5.000000e-03 : f32
        %68 = vector.broadcast %cst_42 : f32 to vector<16x1xf32>
        %69 = arith.mulf %67, %68 : vector<16x1xf32>
        %c1_43 = arith.constant 1 : index
        %c0_44 = arith.constant 0 : index
        %c0_45 = arith.constant 0 : index
        %70 = vector.load %arg13[%c1_43, %c0_44, %c0_45] : memref<3x32x1xf32, #tpu.memory_space<vmem>>, vector<1x16x1xf32>
        %71 = vector.shape_cast %70 : vector<1x16x1xf32> to vector<16x1xf32>
        %cst_46 = arith.constant 5.000000e-03 : f32
        %72 = vector.broadcast %cst_46 : f32 to vector<16x1xf32>
        %73 = arith.mulf %71, %72 : vector<16x1xf32>
        %74 = arith.mulf %69, %69 : vector<16x1xf32>
        %75 = arith.subf %73, %74 : vector<16x1xf32>
        %cst_47 = arith.constant 9.99999974E-6 : f32
        %76 = vector.broadcast %cst_47 : f32 to vector<16x1xf32>
        %77 = arith.addf %75, %76 : vector<16x1xf32>
        %78 = math.rsqrt %77 : vector<16x1xf32>
        %79 = arith.mulf %64, %78 : vector<16x1xf32>
        %c1_48 = arith.constant 1 : index
        %c0_49 = arith.constant 0 : index
        %c0_50 = arith.constant 0 : index
        %80 = vector.load %arg14[%c1_48, %c0_49, %c0_50] : memref<3x32x1xf32, #tpu.memory_space<vmem>>, vector<1x16x1xf32>
        %81 = vector.shape_cast %80 : vector<1x16x1xf32> to vector<16x1xf32>
        %82 = vector.shape_cast %79 : vector<16x1xf32> to vector<1x16x1xf32>
        tpu.vector_store %arg14[%c1_48, %c0_49, %c0_50], %82 {strides = array<i32>} : memref<3x32x1xf32, #tpu.memory_space<vmem>>, vector<1x16x1xf32>,
        %83 = arith.mulf %69, %79 : vector<16x1xf32>
        %84 = arith.subf %65, %83 : vector<16x1xf32>
        %c1_51 = arith.constant 1 : index
        %c0_52 = arith.constant 0 : index
        %c0_53 = arith.constant 0 : index
        %85 = vector.load %arg15[%c1_51, %c0_52, %c0_53] : memref<3x32x1xf32, #tpu.memory_space<vmem>>, vector<1x16x1xf32>
        %86 = vector.shape_cast %85 : vector<1x16x1xf32> to vector<16x1xf32>
        %87 = vector.shape_cast %84 : vector<16x1xf32> to vector<1x16x1xf32>
        tpu.vector_store %arg15[%c1_51, %c0_52, %c0_53], %87 {strides = array<i32>} : memref<3x32x1xf32, #tpu.memory_space<vmem>>, vector<1x16x1xf32>,
      } else {
      }
    } else {
    }
    %c2_i32 = arith.constant 2 : i32
    %15 = arith.cmpi eq, %arg0, %c2_i32 : i32
    %16 = arith.extui %15 : i1 to i32
    %c0_i32_3 = arith.constant 0 : i32
    %17 = arith.cmpi ne, %16, %c0_i32_3 : i32
    scf.if %17 {
      %c0 = arith.constant 0 : index
      %c0_6 = arith.constant 0 : index
      %21 = vector.load %arg3[%c0, %c0_6] : memref<32x26xf32, #tpu.memory_space<vmem>>, vector<32x26xf32>
      %c0_7 = arith.constant 0 : index
      %c0_8 = arith.constant 0 : index
      %22 = vector.load %arg2[%c0_7, %c0_8] : memref<128x26xf32, #tpu.memory_space<vmem>>, vector<128x26xf32>
      %cst = arith.constant dense<0.000000e+00> : vector<32x128xf32>
      %23 = tpu.matmul %21, %22, %cst {dimension_numbers = #tpu.dot_dimension_numbers<[1], [1], [0], [0], [0, 0, 1, 0], [], []>} : vector<32x26xf32>, vector<128x26xf32>, vector<32x128xf32> -> vector<32x128xf32>
      %c0_9 = arith.constant 0 : index
      %c0_10 = arith.constant 0 : index
      %c0_11 = arith.constant 0 : index
      %24 = vector.load %arg14[%c0_9, %c0_10, %c0_11] : memref<3x32x1xf32, #tpu.memory_space<vmem>>, vector<1x32x1xf32>
      %25 = vector.shape_cast %24 : vector<1x32x1xf32> to vector<32x1xf32>
      %c0_12 = arith.constant 0 : index
      %c0_13 = arith.constant 0 : index
      %c0_14 = arith.constant 0 : index
      %26 = vector.load %arg15[%c0_12, %c0_13, %c0_14] : memref<3x32x1xf32, #tpu.memory_space<vmem>>, vector<1x32x1xf32>
      %27 = vector.shape_cast %26 : vector<1x32x1xf32> to vector<32x1xf32>
      %28 = vector.broadcast %25 : vector<32x1xf32> to vector<32x128xf32>
      %29 = arith.mulf %23, %28 : vector<32x128xf32>
      %30 = vector.broadcast %27 : vector<32x1xf32> to vector<32x128xf32>
      %31 = arith.addf %29, %30 : vector<32x128xf32>
      %cst_15 = arith.constant 0.000000e+00 : f32
      %32 = vector.broadcast %cst_15 : f32 to vector<32x128xf32>
      %33 = arith.maximumf %31, %32 : vector<32x128xf32>
      %c0_16 = arith.constant 0 : index
      %c0_17 = arith.constant 0 : index
      %34 = vector.load %arg4[%c0_16, %c0_17] : memref<16x32xf32, #tpu.memory_space<vmem>>, vector<16x32xf32>
      %cst_18 = arith.constant dense<0.000000e+00> : vector<16x128xf32>
      %35 = tpu.matmul %34, %33, %cst_18 {dimension_numbers = #tpu.dot_dimension_numbers<[1], [0], [0], [1], [0, 0, 1, 1], [], []>} : vector<16x32xf32>, vector<32x128xf32>, vector<16x128xf32> -> vector<16x128xf32>
      %c1 = arith.constant 1 : index
      %c0_19 = arith.constant 0 : index
      %c0_20 = arith.constant 0 : index
      %36 = vector.load %arg14[%c1, %c0_19, %c0_20] : memref<3x32x1xf32, #tpu.memory_space<vmem>>, vector<1x16x1xf32>
      %37 = vector.shape_cast %36 : vector<1x16x1xf32> to vector<16x1xf32>
      %c1_21 = arith.constant 1 : index
      %c0_22 = arith.constant 0 : index
      %c0_23 = arith.constant 0 : index
      %38 = vector.load %arg15[%c1_21, %c0_22, %c0_23] : memref<3x32x1xf32, #tpu.memory_space<vmem>>, vector<1x16x1xf32>
      %39 = vector.shape_cast %38 : vector<1x16x1xf32> to vector<16x1xf32>
      %40 = vector.broadcast %37 : vector<16x1xf32> to vector<16x128xf32>
      %41 = arith.mulf %35, %40 : vector<16x128xf32>
      %42 = vector.broadcast %39 : vector<16x1xf32> to vector<16x128xf32>
      %43 = arith.addf %41, %42 : vector<16x128xf32>
      %cst_24 = arith.constant 0.000000e+00 : f32
      %44 = vector.broadcast %cst_24 : f32 to vector<16x128xf32>
      %45 = arith.maximumf %43, %44 : vector<16x128xf32>
      %c0_25 = arith.constant 0 : index
      %c0_26 = arith.constant 0 : index
      %46 = vector.load %arg5[%c0_25, %c0_26] : memref<8x16xf32, #tpu.memory_space<vmem>>, vector<8x16xf32>
      %cst_27 = arith.constant dense<0.000000e+00> : vector<8x128xf32>
      %47 = tpu.matmul %46, %45, %cst_27 {dimension_numbers = #tpu.dot_dimension_numbers<[1], [0], [0], [1], [0, 0, 1, 1], [], []>} : vector<8x16xf32>, vector<16x128xf32>, vector<8x128xf32> -> vector<8x128xf32>
      %cst_28 = arith.constant 0.000000e+00 : f32
      %48 = vector.shape_cast %5 : vector<1x128xi1> to vector<1x128xi1>
      %49 = vector.broadcast %48 : vector<1x128xi1> to vector<8x128xi1>
      %50 = vector.broadcast %cst_28 : f32 to vector<8x128xf32>
      %51 = arith.select %49, %47, %50 : vector<8x128xi1>, vector<8x128xf32>
      %c0_i32_29 = arith.constant 0 : i32
      %52 = arith.cmpi eq, %arg1, %c0_i32_29 : i32
      %53 = arith.extui %52 : i1 to i32
      %c0_i32_30 = arith.constant 0 : i32
      %54 = arith.cmpi ne, %53, %c0_i32_30 : i32
      scf.if %54 {
        %cst_46 = arith.constant 0.000000e+00 : f32
        %75 = vector.broadcast %cst_46 : f32 to vector<8x1xf32>
        %c2_47 = arith.constant 2 : index
        %c0_48 = arith.constant 0 : index
        %c0_49 = arith.constant 0 : index
        %76 = vector.load %arg12[%c2_47, %c0_48, %c0_49] : memref<3x32x1xf32, #tpu.memory_space<vmem>>, vector<1x8x1xf32>
        %77 = vector.shape_cast %76 : vector<1x8x1xf32> to vector<8x1xf32>
        %78 = vector.shape_cast %75 : vector<8x1xf32> to vector<1x8x1xf32>
        tpu.vector_store %arg12[%c2_47, %c0_48, %c0_49], %78 {strides = array<i32>} : memref<3x32x1xf32, #tpu.memory_space<vmem>>, vector<1x8x1xf32>,
        %cst_50 = arith.constant 0.000000e+00 : f32
        %79 = vector.broadcast %cst_50 : f32 to vector<8x1xf32>
        %c2_51 = arith.constant 2 : index
        %c0_52 = arith.constant 0 : index
        %c0_53 = arith.constant 0 : index
        %80 = vector.load %arg13[%c2_51, %c0_52, %c0_53] : memref<3x32x1xf32, #tpu.memory_space<vmem>>, vector<1x8x1xf32>
        %81 = vector.shape_cast %80 : vector<1x8x1xf32> to vector<8x1xf32>
        %82 = vector.shape_cast %79 : vector<8x1xf32> to vector<1x8x1xf32>
        tpu.vector_store %arg13[%c2_51, %c0_52, %c0_53], %82 {strides = array<i32>} : memref<3x32x1xf32, #tpu.memory_space<vmem>>, vector<1x8x1xf32>,
      } else {
      }
      %c2 = arith.constant 2 : index
      %c0_31 = arith.constant 0 : index
      %c0_32 = arith.constant 0 : index
      %55 = vector.load %arg12[%c2, %c0_31, %c0_32] : memref<3x32x1xf32, #tpu.memory_space<vmem>>, vector<1x8x1xf32>
      %56 = vector.shape_cast %55 : vector<1x8x1xf32> to vector<8x1xf32>
      %cst_33 = arith.constant dense<0.000000e+00> : vector<8xf32>
      %57 = vector.multi_reduction <add>, %51, %cst_33 [1] : vector<8x128xf32> to vector<8xf32>
      %58 = vector.shape_cast %57 : vector<8xf32> to vector<8x1xf32>
      %59 = arith.addf %56, %58 : vector<8x1xf32>
      %c2_34 = arith.constant 2 : index
      %c0_35 = arith.constant 0 : index
      %c0_36 = arith.constant 0 : index
      %60 = vector.load %arg12[%c2_34, %c0_35, %c0_36] : memref<3x32x1xf32, #tpu.memory_space<vmem>>, vector<1x8x1xf32>
      %61 = vector.shape_cast %60 : vector<1x8x1xf32> to vector<8x1xf32>
      %62 = vector.shape_cast %59 : vector<8x1xf32> to vector<1x8x1xf32>
      tpu.vector_store %arg12[%c2_34, %c0_35, %c0_36], %62 {strides = array<i32>} : memref<3x32x1xf32, #tpu.memory_space<vmem>>, vector<1x8x1xf32>,
      %c2_37 = arith.constant 2 : index
      %c0_38 = arith.constant 0 : index
      %c0_39 = arith.constant 0 : index
      %63 = vector.load %arg13[%c2_37, %c0_38, %c0_39] : memref<3x32x1xf32, #tpu.memory_space<vmem>>, vector<1x8x1xf32>
      %64 = vector.shape_cast %63 : vector<1x8x1xf32> to vector<8x1xf32>
      %65 = arith.mulf %51, %51 : vector<8x128xf32>
      %cst_40 = arith.constant dense<0.000000e+00> : vector<8xf32>
      %66 = vector.multi_reduction <add>, %65, %cst_40 [1] : vector<8x128xf32> to vector<8xf32>
      %67 = vector.shape_cast %66 : vector<8xf32> to vector<8x1xf32>
      %68 = arith.addf %64, %67 : vector<8x1xf32>
      %c2_41 = arith.constant 2 : index
      %c0_42 = arith.constant 0 : index
      %c0_43 = arith.constant 0 : index
      %69 = vector.load %arg13[%c2_41, %c0_42, %c0_43] : memref<3x32x1xf32, #tpu.memory_space<vmem>>, vector<1x8x1xf32>
      %70 = vector.shape_cast %69 : vector<1x8x1xf32> to vector<8x1xf32>
      %71 = vector.shape_cast %68 : vector<8x1xf32> to vector<1x8x1xf32>
      tpu.vector_store %arg13[%c2_41, %c0_42, %c0_43], %71 {strides = array<i32>} : memref<3x32x1xf32, #tpu.memory_space<vmem>>, vector<1x8x1xf32>,
      %c1_i32_44 = arith.constant 1 : i32
      %72 = arith.cmpi eq, %arg1, %c1_i32_44 : i32
      %73 = arith.extui %72 : i1 to i32
      %c0_i32_45 = arith.constant 0 : i32
      %74 = arith.cmpi ne, %73, %c0_i32_45 : i32
      scf.if %74 {
        %c0_46 = arith.constant 0 : index
        %c0_47 = arith.constant 0 : index
        %75 = vector.load %arg9[%c0_46, %c0_47] : memref<8x2xf32, #tpu.memory_space<vmem>>, vector<8x2xf32>
        %76 = vector.extract_strided_slice %75 {offsets = [0, 0], sizes = [8, 1], strides = [1, 1]} : vector<8x2xf32> to vector<8x1xf32>
        %77 = vector.extract_strided_slice %75 {offsets = [0, 1], sizes = [8, 1], strides = [1, 1]} : vector<8x2xf32> to vector<8x1xf32>
        %c2_48 = arith.constant 2 : index
        %c0_49 = arith.constant 0 : index
        %c0_50 = arith.constant 0 : index
        %78 = vector.load %arg12[%c2_48, %c0_49, %c0_50] : memref<3x32x1xf32, #tpu.memory_space<vmem>>, vector<1x8x1xf32>
        %79 = vector.shape_cast %78 : vector<1x8x1xf32> to vector<8x1xf32>
        %cst_51 = arith.constant 5.000000e-03 : f32
        %80 = vector.broadcast %cst_51 : f32 to vector<8x1xf32>
        %81 = arith.mulf %79, %80 : vector<8x1xf32>
        %c2_52 = arith.constant 2 : index
        %c0_53 = arith.constant 0 : index
        %c0_54 = arith.constant 0 : index
        %82 = vector.load %arg13[%c2_52, %c0_53, %c0_54] : memref<3x32x1xf32, #tpu.memory_space<vmem>>, vector<1x8x1xf32>
        %83 = vector.shape_cast %82 : vector<1x8x1xf32> to vector<8x1xf32>
        %cst_55 = arith.constant 5.000000e-03 : f32
        %84 = vector.broadcast %cst_55 : f32 to vector<8x1xf32>
        %85 = arith.mulf %83, %84 : vector<8x1xf32>
        %86 = arith.mulf %81, %81 : vector<8x1xf32>
        %87 = arith.subf %85, %86 : vector<8x1xf32>
        %cst_56 = arith.constant 9.99999974E-6 : f32
        %88 = vector.broadcast %cst_56 : f32 to vector<8x1xf32>
        %89 = arith.addf %87, %88 : vector<8x1xf32>
        %90 = math.rsqrt %89 : vector<8x1xf32>
        %91 = arith.mulf %76, %90 : vector<8x1xf32>
        %c2_57 = arith.constant 2 : index
        %c0_58 = arith.constant 0 : index
        %c0_59 = arith.constant 0 : index
        %92 = vector.load %arg14[%c2_57, %c0_58, %c0_59] : memref<3x32x1xf32, #tpu.memory_space<vmem>>, vector<1x8x1xf32>
        %93 = vector.shape_cast %92 : vector<1x8x1xf32> to vector<8x1xf32>
        %94 = vector.shape_cast %91 : vector<8x1xf32> to vector<1x8x1xf32>
        tpu.vector_store %arg14[%c2_57, %c0_58, %c0_59], %94 {strides = array<i32>} : memref<3x32x1xf32, #tpu.memory_space<vmem>>, vector<1x8x1xf32>,
        %95 = arith.mulf %81, %91 : vector<8x1xf32>
        %96 = arith.subf %77, %95 : vector<8x1xf32>
        %c2_60 = arith.constant 2 : index
        %c0_61 = arith.constant 0 : index
        %c0_62 = arith.constant 0 : index
        %97 = vector.load %arg15[%c2_60, %c0_61, %c0_62] : memref<3x32x1xf32, #tpu.memory_space<vmem>>, vector<1x8x1xf32>
        %98 = vector.shape_cast %97 : vector<1x8x1xf32> to vector<8x1xf32>
        %99 = vector.shape_cast %96 : vector<8x1xf32> to vector<1x8x1xf32>
        tpu.vector_store %arg15[%c2_60, %c0_61, %c0_62], %99 {strides = array<i32>} : memref<3x32x1xf32, #tpu.memory_space<vmem>>, vector<1x8x1xf32>,
      } else {
      }
    } else {
    }
    %c3_i32_4 = arith.constant 3 : i32
    %18 = arith.cmpi eq, %arg0, %c3_i32_4 : i32
    %19 = arith.extui %18 : i1 to i32
    %c0_i32_5 = arith.constant 0 : i32
    %20 = arith.cmpi ne, %19, %c0_i32_5 : i32
    scf.if %20 {
      %c0 = arith.constant 0 : index
      %c0_6 = arith.constant 0 : index
      %21 = vector.load %arg3[%c0, %c0_6] : memref<32x26xf32, #tpu.memory_space<vmem>>, vector<32x26xf32>
      %c0_7 = arith.constant 0 : index
      %c0_8 = arith.constant 0 : index
      %22 = vector.load %arg2[%c0_7, %c0_8] : memref<128x26xf32, #tpu.memory_space<vmem>>, vector<128x26xf32>
      %cst = arith.constant dense<0.000000e+00> : vector<32x128xf32>
      %23 = tpu.matmul %21, %22, %cst {dimension_numbers = #tpu.dot_dimension_numbers<[1], [1], [0], [0], [0, 0, 1, 0], [], []>} : vector<32x26xf32>, vector<128x26xf32>, vector<32x128xf32> -> vector<32x128xf32>
      %c0_9 = arith.constant 0 : index
      %c0_10 = arith.constant 0 : index
      %c0_11 = arith.constant 0 : index
      %24 = vector.load %arg14[%c0_9, %c0_10, %c0_11] : memref<3x32x1xf32, #tpu.memory_space<vmem>>, vector<1x32x1xf32>
      %25 = vector.shape_cast %24 : vector<1x32x1xf32> to vector<32x1xf32>
      %c0_12 = arith.constant 0 : index
      %c0_13 = arith.constant 0 : index
      %c0_14 = arith.constant 0 : index
      %26 = vector.load %arg15[%c0_12, %c0_13, %c0_14] : memref<3x32x1xf32, #tpu.memory_space<vmem>>, vector<1x32x1xf32>
      %27 = vector.shape_cast %26 : vector<1x32x1xf32> to vector<32x1xf32>
      %28 = vector.broadcast %25 : vector<32x1xf32> to vector<32x128xf32>
      %29 = arith.mulf %23, %28 : vector<32x128xf32>
      %30 = vector.broadcast %27 : vector<32x1xf32> to vector<32x128xf32>
      %31 = arith.addf %29, %30 : vector<32x128xf32>
      %cst_15 = arith.constant 0.000000e+00 : f32
      %32 = vector.broadcast %cst_15 : f32 to vector<32x128xf32>
      %33 = arith.maximumf %31, %32 : vector<32x128xf32>
      %c0_16 = arith.constant 0 : index
      %c0_17 = arith.constant 0 : index
      %34 = vector.load %arg4[%c0_16, %c0_17] : memref<16x32xf32, #tpu.memory_space<vmem>>, vector<16x32xf32>
      %cst_18 = arith.constant dense<0.000000e+00> : vector<16x128xf32>
      %35 = tpu.matmul %34, %33, %cst_18 {dimension_numbers = #tpu.dot_dimension_numbers<[1], [0], [0], [1], [0, 0, 1, 1], [], []>} : vector<16x32xf32>, vector<32x128xf32>, vector<16x128xf32> -> vector<16x128xf32>
      %c1 = arith.constant 1 : index
      %c0_19 = arith.constant 0 : index
      %c0_20 = arith.constant 0 : index
      %36 = vector.load %arg14[%c1, %c0_19, %c0_20] : memref<3x32x1xf32, #tpu.memory_space<vmem>>, vector<1x16x1xf32>
      %37 = vector.shape_cast %36 : vector<1x16x1xf32> to vector<16x1xf32>
      %c1_21 = arith.constant 1 : index
      %c0_22 = arith.constant 0 : index
      %c0_23 = arith.constant 0 : index
      %38 = vector.load %arg15[%c1_21, %c0_22, %c0_23] : memref<3x32x1xf32, #tpu.memory_space<vmem>>, vector<1x16x1xf32>
      %39 = vector.shape_cast %38 : vector<1x16x1xf32> to vector<16x1xf32>
      %40 = vector.broadcast %37 : vector<16x1xf32> to vector<16x128xf32>
      %41 = arith.mulf %35, %40 : vector<16x128xf32>
      %42 = vector.broadcast %39 : vector<16x1xf32> to vector<16x128xf32>
      %43 = arith.addf %41, %42 : vector<16x128xf32>
      %cst_24 = arith.constant 0.000000e+00 : f32
      %44 = vector.broadcast %cst_24 : f32 to vector<16x128xf32>
      %45 = arith.maximumf %43, %44 : vector<16x128xf32>
      %c0_25 = arith.constant 0 : index
      %c0_26 = arith.constant 0 : index
      %46 = vector.load %arg5[%c0_25, %c0_26] : memref<8x16xf32, #tpu.memory_space<vmem>>, vector<8x16xf32>
      %cst_27 = arith.constant dense<0.000000e+00> : vector<8x128xf32>
      %47 = tpu.matmul %46, %45, %cst_27 {dimension_numbers = #tpu.dot_dimension_numbers<[1], [0], [0], [1], [0, 0, 1, 1], [], []>} : vector<8x16xf32>, vector<16x128xf32>, vector<8x128xf32> -> vector<8x128xf32>
      %c2 = arith.constant 2 : index
      %c0_28 = arith.constant 0 : index
      %c0_29 = arith.constant 0 : index
      %48 = vector.load %arg14[%c2, %c0_28, %c0_29] : memref<3x32x1xf32, #tpu.memory_space<vmem>>, vector<1x8x1xf32>
      %49 = vector.shape_cast %48 : vector<1x8x1xf32> to vector<8x1xf32>
      %c2_30 = arith.constant 2 : index
      %c0_31 = arith.constant 0 : index
      %c0_32 = arith.constant 0 : index
      %50 = vector.load %arg15[%c2_30, %c0_31, %c0_32] : memref<3x32x1xf32, #tpu.memory_space<vmem>>, vector<1x8x1xf32>
      %51 = vector.shape_cast %50 : vector<1x8x1xf32> to vector<8x1xf32>
      %52 = vector.broadcast %49 : vector<8x1xf32> to vector<8x128xf32>
      %53 = arith.mulf %47, %52 : vector<8x128xf32>
      %54 = vector.broadcast %51 : vector<8x1xf32> to vector<8x128xf32>
      %55 = arith.addf %53, %54 : vector<8x128xf32>
      %cst_33 = arith.constant 0.000000e+00 : f32
      %56 = vector.broadcast %cst_33 : f32 to vector<8x128xf32>
      %57 = arith.maximumf %55, %56 : vector<8x128xf32>
      %c0_34 = arith.constant 0 : index
      %c0_35 = arith.constant 0 : index
      %58 = vector.load %arg6[%c0_34, %c0_35] : memref<8x1xf32, #tpu.memory_space<vmem>>, vector<8x1xf32>
      %59 = vector.broadcast %58 : vector<8x1xf32> to vector<8x128xf32>
      %60 = arith.mulf %59, %57 : vector<8x128xf32>
      %cst_36 = arith.constant dense<0.000000e+00> : vector<128xf32>
      %61 = vector.multi_reduction <add>, %60, %cst_36 [0] : vector<8x128xf32> to vector<128xf32>
      %62 = vector.shape_cast %61 : vector<128xf32> to vector<1x128xf32>
      %c0_37 = arith.constant 0 : index
      %c0_38 = arith.constant 0 : index
      %63 = vector.load %arg10[%c0_37, %c0_38] : memref<1x1xf32, #tpu.memory_space<vmem>>, vector<1x1xf32>
      %64 = vector.broadcast %63 : vector<1x1xf32> to vector<1x128xf32>
      %65 = arith.addf %62, %64 : vector<1x128xf32>
      %c0_39 = arith.constant 0 : index
      %c0_40 = arith.constant 0 : index
      %66 = vector.load %arg11[%c0_39, %c0_40] : memref<1x128xf32, #tpu.memory_space<vmem>>, vector<1x128xf32>
      tpu.vector_store %arg11[%c0_39, %c0_40], %65 {strides = array<i32>} : memref<1x128xf32, #tpu.memory_space<vmem>>, vector<1x128xf32>,
    } else {
    }
    return
  }
  func.func @transform_0(%arg0: i32, %arg1: i32) -> (i32, i32) {
    %c0_i32 = arith.constant 0 : i32
    %c0_i32_0 = arith.constant 0 : i32
    return %arg1, %c0_i32 : i32, i32
  }
  func.func @transform_1(%arg0: i32, %arg1: i32) -> (i32, i32) {
    %c0_i32 = arith.constant 0 : i32
    %c0_i32_0 = arith.constant 0 : i32
    %c0_i32_1 = arith.constant 0 : i32
    return %c0_i32, %c0_i32_0 : i32, i32
  }
  func.func @transform_2(%arg0: i32, %arg1: i32) -> (i32, i32) {
    %c0_i32 = arith.constant 0 : i32
    %c0_i32_0 = arith.constant 0 : i32
    %c0_i32_1 = arith.constant 0 : i32
    return %c0_i32, %c0_i32_0 : i32, i32
  }
  func.func @transform_3(%arg0: i32, %arg1: i32) -> (i32, i32) {
    %c0_i32 = arith.constant 0 : i32
    %c0_i32_0 = arith.constant 0 : i32
    %c0_i32_1 = arith.constant 0 : i32
    return %c0_i32, %c0_i32_0 : i32, i32
  }
  func.func @transform_4(%arg0: i32, %arg1: i32) -> (i32, i32) {
    %c0_i32 = arith.constant 0 : i32
    %c0_i32_0 = arith.constant 0 : i32
    %c0_i32_1 = arith.constant 0 : i32
    return %c0_i32, %c0_i32_0 : i32, i32
  }
  func.func @transform_5(%arg0: i32, %arg1: i32) -> (i32, i32) {
    %c0_i32 = arith.constant 0 : i32
    %c0_i32_0 = arith.constant 0 : i32
    %c0_i32_1 = arith.constant 0 : i32
    return %c0_i32, %c0_i32_0 : i32, i32
  }
  func.func @transform_6(%arg0: i32, %arg1: i32) -> (i32, i32) {
    %c0_i32 = arith.constant 0 : i32
    %c0_i32_0 = arith.constant 0 : i32
    %c0_i32_1 = arith.constant 0 : i32
    return %c0_i32, %c0_i32_0 : i32, i32
  }
  func.func @transform_7(%arg0: i32, %arg1: i32) -> (i32, i32) {
    %c0_i32 = arith.constant 0 : i32
    %c0_i32_0 = arith.constant 0 : i32
    %c0_i32_1 = arith.constant 0 : i32
    return %c0_i32, %c0_i32_0 : i32, i32
  }
  func.func @transform_8(%arg0: i32, %arg1: i32) -> (i32, i32) {
    %c0_i32 = arith.constant 0 : i32
    %c0_i32_0 = arith.constant 0 : i32
    %c0_i32_1 = arith.constant 0 : i32
    return %c0_i32, %c0_i32_0 : i32, i32
  }
  func.func @transform_9(%arg0: i32, %arg1: i32) -> (i32, i32) {
    %c0_i32 = arith.constant 0 : i32
    %c0_i32_0 = arith.constant 0 : i32
    return %c0_i32, %arg1 : i32, i32
  }
}

</mosaic_0001>

<bundles_post_ra>
// kernel: tpu_custom_call.1
= control target key start
LH: loop header
LB: loop body
LE: loop exit
PB: predicated region body
PF: predicated region fallthrough
CT: control target
= control target key end

     0   :  { %s2738_s0 = inlined_call_operand.vmem [shape: f32[256,26], index: 0, kind: input, shape index: {}]   ;;  %s2739_s1 = inlined_call_operand.vmem [shape: f32[32,26], index: 1, kind: input, shape index: {}]   ;;  %s2740_s2 = inlined_call_operand.vmem [shape: f32[16,32], index: 2, kind: input, shape index: {}]   ;;  %s2741_s3 = inlined_call_operand.vmem [shape: f32[8,16], index: 3, kind: input, shape index: {}]   ;;  %s2742_s4 = inlined_call_operand.vmem [shape: f32[8,1], index: 4, kind: input, shape index: {}]   ;;  %s2743_s5 = inlined_call_operand.vmem [shape: f32[32,2], index: 5, kind: input, shape index: {}]   ;;  %s2744_s6 = inlined_call_operand.vmem [shape: f32[16,2], index: 6, kind: input, shape index: {}]   ;;  %s2745_s7 = inlined_call_operand.vmem [shape: f32[8,2], index: 7, kind: input, shape index: {}]   ;;  %s2746_s8 = inlined_call_operand.<no memory space> [shape: f32[1,1], index: 8, kind: input, shape index: {}]   ;;  %s2747_s9 = inlined_call_operand.hbm [shape: f32[1,256], index: 9, kind: output, shape index: {}]  }
   0x1   :  { %2749 = sst [smem:[#allocation10_spill]] %s2738_s0  ;;  %v14_v0 = vstv %s2746_s8 }
   0x2   :  { %2750 = sst [smem:[#allocation11_spill]] %s2739_s1  ;;  %15 = vst [vmem:[#allocation6] sm:$0x1] %v14_v0 }
   0x3   :  { %2751 = sst [smem:[#allocation12_spill]] %s2740_s2 }
   0x4   :  { %16 = vsyncpa [#allocation8], 0 }
   0x5   :  { %18 = vsyncpa [#allocation8 + $0x1], 0  ;;  %s2174_s11 = smov 0   ;;  %s2176_s12 = smov 0  }
   0x6   :  { %s2178_s13 = smov 0   ;;  %s2180_s14 = smov 0  }
   0x7   :  { %s2182_s15 = smov 0   ;;  %s2184_s16 = smov 0  }
   0x8   :  { %s2186_s17 = smov 0   ;;  %s2188_s18 = smov 0  }
   0x9 LB: > { %s1684_s8 = sadd.s32 4294967295, %s2106_s18   ;;  %s1685_s19 = sadd.s32 4294967294, %s2106_s18   ;;  %s2106_s18 = sphi %s2188_s18, %s24_s18   ;;  %s2102_s17 = sphi %s2186_s17, %s2771_s17   ;;  %s2098_s16 = sphi %s2184_s16, %s2770_s16   ;;  %s2094_s15 = sphi %s2182_s15, %s2769_s15   ;;  %s2090_s14 = sphi %s2180_s14, %s2768_s14   ;;  %s2086_s13 = sphi %s2178_s13, %s2767_s13   ;;  %s2082_s12 = sphi %s2176_s12, %s2766_s12   ;;  %s2078_s11 = sphi %s2174_s11, %s2765_s11  }
   0xa   : > { %s33_s20 = sadd.s32 1, %s2098_s16  ;;  %s36_s21 = sadd.s32 1, %s2102_s17 }
   0xb   : > { %p34_p0 = scmp.ge.s32.totalorder %s33_s20, 2  ;;  %s237_s22 = sadd.s32 1, %s2086_s13 }
   0xc   : > { %p247_p1 = scmp.ne.s32.totalorder %s2086_s13, %s2082_s12  ;;  %p248_p2 = scmp.eq.s32.totalorder %s1684_s8, 7 }
   0xd   : > { %s2773_s20 = smov (%p34_p0, %s33_s20), 0  ;;  %s2775_s21 = smov (!%p34_p0, %s36_s21), %s2102_s17 }
   0xe   : > { %s234_s23 = ssub.s32 %s2098_s16, %s2773_s20  ;;  %p2226_p3 = por %p248_p2, %p247_p1 }
   0xf   : > { %p38_p4 = scmp.ge.s32.totalorder %s2775_s21, 4  ;;  %p235_p5 = scmp.eq.s32.totalorder %s234_s23, 0 }
  0x10   : > { %p253_p6 = scmp.ne.s32.totalorder %s2082_s12, %s2078_s11  ;;  %p254_p7 = scmp.eq.s32.totalorder %s1685_s19, 7 }
  0x11   : > { %s2777_s21 = smov (%p38_p4, %s2775_s21), 0  ;;  %p1688_p9 = scmp.ge.s32.totalorder %s2106_s18, 1 }
  0x12   : > { %s2235_s25 = scalar_select %p235_p5, %s2086_s13, %s237_s22  }
  0x13   : > { %p2237_p8 = por %p254_p7, %p253_p6  ;;  %p305_p10 = scmp.lt.s32.totalorder %s2106_s18, 9 }
  0x15   : > { %p306_p11 = pnand %p1688_p9, %p305_p10 }
  0x16   : > { %s2748_s27 = sand.u32 (!%p306_p11), 1, %s2082_s12   ;;  %s1689_s28 = sshll.u32 (!%p306_p11), %s2090_s14, 4 }
  0x17   : > { %309 = sbr.rel (%p306_p11) target bundleno = 2877 (0xb3d), region = 56  ;;  %p341_p12 = scmp.lt.s32.totalorder (!%p306_p11), %s1689_s28, 31 }
  0x18   : > { %s1691_s29 = sshll.u32 (!%p306_p11), %s2090_s14, 7  ;;  %s2754_s0 = sld [smem:[#allocation10_spill]] (!%p306_p11) }
  0x19   : > { %s2256_s22 = scalar_lea.vmem (!%p306_p11), [#allocation7], %s2748_s27  ;;  %p1692_p13 = scmp.ge.s32.totalorder (!%p306_p11), %s2094_s15, 3 }
  0x1c   : > { %v347_v1 = vlaneseq  ;;  %s2779_s28 = smov (!%p341_p12, %s1689_s28), 31  ;;  %v349_v3 = vstv %s1691_s29 }
  0x1d   : > { %s1690_s30 = sshll.u32 %s2779_s28, 3 }
  0x1e   : > { %v348_v2 = vand.u32 127, %v347_v1  ;;  %s2251_s19 = scalar_lea.vmem %s2754_s0, %s1690_s30  ;;  %355 = sbr.rel (%p1692_p13) target bundleno = 37 (0x25), region = 60 }
  0x20   : > { %v2246_v4 = vadd.s32 %v349_v3, %v348_v2 }
  0x22   : > { %vm351_vm0 = vcmp.lt.s32.totalorder %v2246_v4, 200 }
  0x23   : > { %v2108_v5 = vmov 0.0  }
  0x24   : > { %356 = vst [vmem:[%s2256_s22] sm:$0x1] %v2108_v5 }
  0x25 PF: > { %p1693_p0 = scmp.ne.s32.totalorder %s2094_s15, 0 }
  0x26   : > { %s2755_s1 = sld [smem:[#allocation11_spill]] (!%p1693_p0)  ;;  %p1714_p1 = scmp.ne.s32.totalorder (!%p1693_p0), %s2090_s14, 0 }
  0x27   : > { %360 = sbr.rel (%p1693_p0) target bundleno = 662 (0x296), region = 64 }
  0x2c   : > { %v380_v6 = vld [vmem:[%s2251_s19 + $0x78] sm:$0xff]  ;;  %vm381_vm1 = vcmask 211968   ;;  %v379_v7 = vld [vmem:[%s2251_s19 + $0x70] sm:$0xff]  ;;  %v378_v8 = vld [vmem:[%s2251_s19 + $0x68] sm:$0xff] }
  0x2d   : > { %1794 = vmatpush.xpose.msk.msra.mxu2 %vm381_vm1, %v380_v6  ;;  %1795 = vmatpush.xpose.msk.msra.mxu3 %vm381_vm1, %v380_v6  ;;  %v377_v9 = vld [vmem:[%s2251_s19 + $0x60] sm:$0xff]  ;;  %v376_v10 = vld [vmem:[%s2251_s19 + $0x58] sm:$0xff]  ;;  %v375_v11 = vld [vmem:[%s2251_s19 + $0x50] sm:$0xff] }
  0x2e   : > { %1694 = vmatpush.xpose.msk.msra.mxu0 %vm381_vm1, %v380_v6  ;;  %1793 = vmatpush.xpose.msk.msra.mxu1 %vm381_vm1, %v380_v6  ;;  %v374_v12 = vld [vmem:[%s2251_s19 + $0x48] sm:$0xff]  ;;  %v373_v13 = vld [vmem:[%s2251_s19 + $0x40] sm:$0xff]  ;;  %v372_v14 = vld [vmem:[%s2251_s19 + $0x38] sm:$0xff] }
  0x2f   : > { %v371_v15 = vld [vmem:[%s2251_s19 + $0x30] sm:$0xff]  ;;  %v370_v16 = vld [vmem:[%s2251_s19 + $0x28] sm:$0xff]  ;;  %v369_v17 = vld [vmem:[%s2251_s19 + $0x20] sm:$0xff] }
  0x30   : > { %v368_v18 = vld [vmem:[%s2251_s19 + $0x18] sm:$0xff]  ;;  %v367_v19 = vld [vmem:[%s2251_s19 + $0x10] sm:$0xff]  ;;  %v366_v20 = vld [vmem:[%s2251_s19 + $0x8] sm:$0xff] }
  0x31   : > { %1797 = vmatpush.xpose.msk.msra.mxu2 %vm381_vm1, %v379_v7  ;;  %1798 = vmatpush.xpose.msk.msra.mxu3 %vm381_vm1, %v379_v7  ;;  %v365_v21 = vld [vmem:[%s2251_s19] sm:$0xff]  ;;  %v363_v22 = vld [vmem:[%s2755_s1 + $0x10] sm:$0xff]  ;;  %v364_v23 = vld [vmem:[%s2755_s1 + $0x18] sm:$0xff] }
  0x32   : > { %1695 = vmatpush.xpose.msk.msra.mxu0 %vm381_vm1, %v379_v7  ;;  %1796 = vmatpush.xpose.msk.msra.mxu1 %vm381_vm1, %v379_v7  ;;  %v361_v24 = vld [vmem:[%s2755_s1] sm:$0xff]  ;;  %v362_v25 = vld [vmem:[%s2755_s1 + $0x8] sm:$0xff] }
  0x35   : > { %1800 = vmatpush.xpose.msk.msra.mxu2 %vm381_vm1, %v378_v8  ;;  %1801 = vmatpush.xpose.msk.msra.mxu3 %vm381_vm1, %v378_v8 }
  0x36   : > { %1696 = vmatpush.xpose.msk.msra.mxu0 %vm381_vm1, %v378_v8  ;;  %1799 = vmatpush.xpose.msk.msra.mxu1 %vm381_vm1, %v378_v8 }
  0x39   : > { %1803 = vmatpush.xpose.msk.msra.mxu2 %vm381_vm1, %v377_v9  ;;  %1804 = vmatpush.xpose.msk.msra.mxu3 %vm381_vm1, %v377_v9 }
  0x3a   : > { %1697 = vmatpush.xpose.msk.msra.mxu0 %vm381_vm1, %v377_v9  ;;  %1802 = vmatpush.xpose.msk.msra.mxu1 %vm381_vm1, %v377_v9 }
  0x3d   : > { %1806 = vmatpush.xpose.msk.msra.mxu2 %vm381_vm1, %v376_v10  ;;  %1807 = vmatpush.xpose.msk.msra.mxu3 %vm381_vm1, %v376_v10 }
  0x3e   : > { %1698 = vmatpush.xpose.msk.msra.mxu0 %vm381_vm1, %v376_v10  ;;  %1805 = vmatpush.xpose.msk.msra.mxu1 %vm381_vm1, %v376_v10 }
  0x41   : > { %1809 = vmatpush.xpose.msk.msra.mxu2 %vm381_vm1, %v375_v11  ;;  %1810 = vmatpush.xpose.msk.msra.mxu3 %vm381_vm1, %v375_v11 }
  0x42   : > { %1699 = vmatpush.xpose.msk.msra.mxu0 %vm381_vm1, %v375_v11  ;;  %1808 = vmatpush.xpose.msk.msra.mxu1 %vm381_vm1, %v375_v11 }
  0x45   : > { %1812 = vmatpush.xpose.msk.msra.mxu2 %vm381_vm1, %v374_v12  ;;  %1813 = vmatpush.xpose.msk.msra.mxu3 %vm381_vm1, %v374_v12 }
  0x46   : > { %1700 = vmatpush.xpose.msk.msra.mxu0 %vm381_vm1, %v374_v12  ;;  %1811 = vmatpush.xpose.msk.msra.mxu1 %vm381_vm1, %v374_v12 }
  0x49   : > { %1815 = vmatpush.xpose.msk.msra.mxu2 %vm381_vm1, %v373_v13  ;;  %1816 = vmatpush.xpose.msk.msra.mxu3 %vm381_vm1, %v373_v13 }
  0x4a   : > { %1701 = vmatpush.xpose.msk.msra.mxu0 %vm381_vm1, %v373_v13  ;;  %1814 = vmatpush.xpose.msk.msra.mxu1 %vm381_vm1, %v373_v13 }
  0x4d   : > { %1818 = vmatpush.xpose.msk.msra.mxu2 %vm381_vm1, %v372_v14  ;;  %1819 = vmatpush.xpose.msk.msra.mxu3 %vm381_vm1, %v372_v14 }
  0x4e   : > { %1702 = vmatpush.xpose.msk.msra.mxu0 %vm381_vm1, %v372_v14  ;;  %1817 = vmatpush.xpose.msk.msra.mxu1 %vm381_vm1, %v372_v14 }
  0x51   : > { %1821 = vmatpush.xpose.msk.msra.mxu2 %vm381_vm1, %v371_v15  ;;  %1822 = vmatpush.xpose.msk.msra.mxu3 %vm381_vm1, %v371_v15 }
  0x52   : > { %1703 = vmatpush.xpose.msk.msra.mxu0 %vm381_vm1, %v371_v15  ;;  %1820 = vmatpush.xpose.msk.msra.mxu1 %vm381_vm1, %v371_v15 }
  0x55   : > { %1824 = vmatpush.xpose.msk.msra.mxu2 %vm381_vm1, %v370_v16  ;;  %1825 = vmatpush.xpose.msk.msra.mxu3 %vm381_vm1, %v370_v16 }
  0x56   : > { %1704 = vmatpush.xpose.msk.msra.mxu0 %vm381_vm1, %v370_v16  ;;  %1823 = vmatpush.xpose.msk.msra.mxu1 %vm381_vm1, %v370_v16 }
  0x59   : > { %1827 = vmatpush.xpose.msk.msra.mxu2 %vm381_vm1, %v369_v17  ;;  %1828 = vmatpush.xpose.msk.msra.mxu3 %vm381_vm1, %v369_v17 }
  0x5a   : > { %1705 = vmatpush.xpose.msk.msra.mxu0 %vm381_vm1, %v369_v17  ;;  %1826 = vmatpush.xpose.msk.msra.mxu1 %vm381_vm1, %v369_v17 }
  0x5d   : > { %1830 = vmatpush.xpose.msk.msra.mxu2 %vm381_vm1, %v368_v18  ;;  %1831 = vmatpush.xpose.msk.msra.mxu3 %vm381_vm1, %v368_v18 }
  0x5e   : > { %1706 = vmatpush.xpose.msk.msra.mxu0 %vm381_vm1, %v368_v18  ;;  %1829 = vmatpush.xpose.msk.msra.mxu1 %vm381_vm1, %v368_v18 }
  0x61   : > { %1833 = vmatpush.xpose.msk.msra.mxu2 %vm381_vm1, %v367_v19  ;;  %1834 = vmatpush.xpose.msk.msra.mxu3 %vm381_vm1, %v367_v19 }
  0x62   : > { %1707 = vmatpush.xpose.msk.msra.mxu0 %vm381_vm1, %v367_v19  ;;  %1832 = vmatpush.xpose.msk.msra.mxu1 %vm381_vm1, %v367_v19 }
  0x65   : > { %1836 = vmatpush.xpose.msk.msra.mxu2 %vm381_vm1, %v366_v20  ;;  %1837 = vmatpush.xpose.msk.msra.mxu3 %vm381_vm1, %v366_v20 }
  0x66   : > { %1708 = vmatpush.xpose.msk.msra.mxu0 %vm381_vm1, %v366_v20  ;;  %1835 = vmatpush.xpose.msk.msra.mxu1 %vm381_vm1, %v366_v20 }
  0x69   : > { %1839 = vmatpush.xpose.msk.msra.mxu2 %vm381_vm1, %v365_v21  ;;  %1840 = vmatpush.xpose.msk.msra.mxu3 %vm381_vm1, %v365_v21 }
  0x6a   : > { %1709 = vmatpush.xpose.msk.msra.mxu0 %vm381_vm1, %v365_v21  ;;  %1838 = vmatpush.xpose.msk.msra.mxu1 %vm381_vm1, %v365_v21 }
  0x6c   : > { %1712 = vmatmul.msk.f32.vlgmr.msra.gmra.mxu2 %vm381_vm1, %v363_v22  ;;  %1713 = vmatmul.msk.f32.vlgmr.msra.gmra.mxu3 %vm381_vm1, %v364_v23 }
  0x6d   : > { %1710 = vmatmul.msk.f32.vlgmr.msra.gmra.mxu0 %vm381_vm1, %v361_v24  ;;  %1711 = vmatmul.msk.f32.vlgmr.msra.gmra.mxu1 %vm381_vm1, %v362_v25 }
  0xea   : > { %v459_v26 = vpop.f32.mrf.mxu0  ;;  %v462_v27 = vpop.f32.mrf.mxu1 }
  0xeb   : > { %v473_v28 = vsel %vm351_vm0, %v459_v26, 0.0  ;;  %v474_v29 = vsel %vm351_vm0, %v462_v27, 0.0 }
  0xec   : > { %480 = sbr.rel (%p1714_p1) target bundleno = 250 (0xfa), region = 68 }
  0xef   : > { %v465_v30 = vpop.f32.mrf.mxu2  ;;  %v468_v31 = vpop.f32.mrf.mxu3 }
  0xf0   : > { %v475_v32 = vsel %vm351_vm0, %v465_v30, 0.0  ;;  %v476_v33 = vsel %vm351_vm0, %v468_v31, 0.0 }
  0xf1   : > { %vm481_vm2 = vcmask 7168   ;;  %v2109_v34 = vmov 0.0  }
  0xf2   : > { %482 = vst.msk [vmem:[#allocation2] sm:$0xff] %vm481_vm2, %v2109_v34 }
  0xf3   : > { %483 = vst.msk [vmem:[#allocation2 + $0x8] sm:$0xff] %vm481_vm2, %v2109_v34 }
  0xf4   : > { %484 = vst.msk [vmem:[#allocation2 + $0x10] sm:$0xff] %vm481_vm2, %v2109_v34 }
  0xf5   : > { %485 = vst.msk [vmem:[#allocation2 + $0x18] sm:$0xff] %vm481_vm2, %v2109_v34 }
  0xf6   : > { %486 = vst.msk [vmem:[#allocation3] sm:$0xff] %vm481_vm2, %v2109_v34 }
  0xf7   : > { %487 = vst.msk [vmem:[#allocation3 + $0x8] sm:$0xff] %vm481_vm2, %v2109_v34 }
  0xf8   : > { %488 = vst.msk [vmem:[#allocation3 + $0x10] sm:$0xff] %vm481_vm2, %v2109_v34 }
  0xf9   : > { %489 = vst.msk [vmem:[#allocation3 + $0x18] sm:$0xff] %vm481_vm2, %v2109_v34 }
  0xfa PF: > { %498 = vadd.xlane.f32.xlu1 %v475_v32  ;;  %494 = vadd.xlane.f32.xlu0 %v473_v28  ;;  %v515_v35 = vmul.f32 %v473_v28, %v473_v28  ;;  %v516_v36 = vmul.f32 %v474_v29, %v474_v29  ;;  %v518_v37 = vmul.f32 %v476_v33, %v476_v33  ;;  %v490_v40 = vld [vmem:[#allocation2] sm:$0xff]  ;;  %vm506_vm3 = vcmask 7168   ;;  %v491_v49 = vld [vmem:[#allocation2 + $0x8] sm:$0xff]  ;;  %p1715_p2 = scmp.ne.s32.totalorder %s2090_s14, 1 }
  0xfb   : > { %v517_v38 = vmul.f32 %v475_v32, %v475_v32  ;;  %v492_v39 = vld [vmem:[#allocation2 + $0x10] sm:$0xff]  ;;  %s2110_s0 = smov (!%p1715_p2), 1   ;;  %s2111_s27 = smov (!%p1715_p2), 127  }
  0xfc   : > { %519 = vadd.xlane.f32.xlu2 %v515_v35  ;;  %v493_v48 = vld [vmem:[#allocation2 + $0x18] sm:$0xff] }
  0xfd   : > { %v511_v43 = vld [vmem:[#allocation3] sm:$0xff] }
  0xfe   : > { %v512_v52 = vld [vmem:[#allocation3 + $0x8] sm:$0xff] }
  0xff   : > { %v513_v58 = vld [vmem:[#allocation3 + $0x10] sm:$0xff] }
 0x100   : > { %v514_v57 = vld [vmem:[#allocation3 + $0x18] sm:$0xff] }
 0x102   : > { %500 = vadd.xlane.f32.xlu1 %v476_v33  ;;  %496 = vadd.xlane.f32.xlu0 %v474_v29 }
 0x104   : > { %521 = vadd.xlane.f32.xlu2 %v516_v36 }
 0x10a   : > { %525 = vadd.xlane.f32.xlu1 %v518_v37  ;;  %523 = vadd.xlane.f32.xlu0 %v517_v38 }
 0x16d   : > { %v499_v41 = vpop.xlane.xlu1 %498  ;;  %v495_v42 = vpop.xlane.xlu0 %494 }
 0x16e   : > { %v504_v44 = vadd.f32 %v499_v41, %v492_v39  ;;  %v502_v45 = vadd.f32 %v495_v42, %v490_v40 }
 0x16f   : > { %v520_v46 = vpop.xlane.xlu2 %519 }
 0x170   : > { %509 = vst.msk [vmem:[#allocation2 + $0x10] sm:$0xff] %vm506_vm3, %v504_v44  ;;  %v527_v47 = vadd.f32 %v520_v46, %v511_v43 }
 0x171   : > { %507 = vst.msk [vmem:[#allocation2] sm:$0xff] %vm506_vm3, %v502_v45 }
 0x172   : > { %531 = vst.msk [vmem:[#allocation3] sm:$0xff] %vm506_vm3, %v527_v47 }
 0x175   : > { %v501_v50 = vpop.xlane.xlu1 %500  ;;  %v497_v51 = vpop.xlane.xlu0 %496 }
 0x176   : > { %v505_v53 = vadd.f32 %v501_v50, %v493_v48  ;;  %v503_v54 = vadd.f32 %v497_v51, %v491_v49 }
 0x177   : > { %v522_v55 = vpop.xlane.xlu2 %521 }
 0x178   : > { %510 = vst.msk [vmem:[#allocation2 + $0x18] sm:$0xff] %vm506_vm3, %v505_v53  ;;  %v528_v56 = vadd.f32 %v522_v55, %v512_v52 }
 0x179   : > { %508 = vst.msk [vmem:[#allocation2 + $0x8] sm:$0xff] %vm506_vm3, %v503_v54 }
 0x17a   : > { %532 = vst.msk [vmem:[#allocation3 + $0x8] sm:$0xff] %vm506_vm3, %v528_v56 }
 0x17d   : > { %v526_v59 = vpop.xlane.xlu1 %525  ;;  %v524_v60 = vpop.xlane.xlu0 %523  ;;  %538 = sbr.rel (%p1715_p2) target bundleno = 662 (0x296), region = 72 }
 0x17e   : > { %v530_v61 = vadd.f32 %v526_v59, %v514_v57  ;;  %v529_v62 = vadd.f32 %v524_v60, %v513_v58 }
 0x180   : > { %534 = vst.msk [vmem:[#allocation3 + $0x18] sm:$0xff] %vm506_vm3, %v530_v61 }
 0x181   : > { %533 = vst.msk [vmem:[#allocation3 + $0x10] sm:$0xff] %vm506_vm3, %v529_v62 }
 0x182   : > { %v545_v63 = vld [vmem:[#allocation2 + $0x10] sm:$0xff]  ;;  %v546_v3 = vld [vmem:[#allocation2 + $0x18] sm:$0xff]  ;;  %v543_v7 = vld [vmem:[#allocation2] sm:$0xff] }
 0x183   : > { %v2375_v1 = vmul.f32 0.005, %v545_v63  ;;  %v2377_v5 = vmul.f32 0.005, %v546_v3  ;;  %v551_v8 = vld [vmem:[#allocation3] sm:$0xff]  ;;  %v544_v14 = vld [vmem:[#allocation2 + $0x8] sm:$0xff] }
 0x184   : > { %v2381_v11 = vmul.f32 0.005, %v543_v7  ;;  %v555_v12 = vmul.f32 0.005, %v551_v8  ;;  %v552_v15 = vld [vmem:[#allocation3 + $0x8] sm:$0xff]  ;;  %v541_v46 = vld [vmem:[%s2743_s5 + $0x10] sm:$0xff] }
 0x185   : > { %v561_v9 = vmul.f32 %v2375_v1, %v2375_v1  ;;  %v562_v13 = vmul.f32 %v2377_v5, %v2377_v5  ;;  %v2387_v18 = vmul.f32 0.005, %v544_v14  ;;  %v556_v19 = vmul.f32 0.005, %v552_v15  ;;  %v542_v50 = vld [vmem:[%s2743_s5 + $0x18] sm:$0xff]  ;;  %v539_v53 = vld [vmem:[%s2743_s5] sm:$0xff] }
 0x186   : > { %v559_v17 = vmul.f32 %v2381_v11, %v2381_v11  ;;  %v540_v60 = vld [vmem:[%s2743_s5 + $0x8] sm:$0xff] }
 0x187   : > { %v554_v6 = vld [vmem:[#allocation3 + $0x18] sm:$0xff]  ;;  %v560_v23 = vmul.f32 %v2387_v18, %v2387_v18 }
 0x188   : > { %v553_v0 = vld [vmem:[#allocation3 + $0x10] sm:$0xff]  ;;  %v558_v10 = vmul.f32 0.005, %v554_v6  ;;  %v563_v22 = vsub.f32 %v555_v12, %v559_v17 }
 0x189   : > { %v557_v2 = vmul.f32 0.005, %v553_v0  ;;  %v564_v26 = vsub.f32 %v556_v19, %v560_v23 }
 0x18a   : > { %v566_v20 = vsub.f32 %v558_v10, %v562_v13  ;;  %v567_v25 = vadd.f32 1e-05, %v563_v22 }
 0x18b   : > { %v565_v16 = vsub.f32 %v557_v2, %v561_v9  ;;  %v568_v27 = vadd.f32 1e-05, %v564_v26 }
 0x18c   : > { %v570_v24 = vadd.f32 1e-05, %v566_v20  ;;  %vm577_vm8 = vweird.f32 %v567_v25 }
 0x18d   : > { %v569_v21 = vadd.f32 1e-05, %v565_v16  ;;  %vm587_vm11 = vweird.f32 %v568_v27 }
 0x18e   : > { %vm607_vm6 = vweird.f32 %v570_v24 }
 0x18f   : > { %1989 = vrsqrt.f32 %v569_v21  ;;  %vm597_vm4 = vweird.f32 %v569_v21 }
 0x190   : > { %1991 = vrsqrt.f32 %v570_v24 }
 0x191   : > { %1993 = vrsqrt.f32 %v567_v25 }
 0x192   : > { %1995 = vrsqrt.f32 %v568_v27 }
 0x195   : > { %v1990_v28 = vpop.eup %1989 }
 0x196   : > { %v1992_v29 = vpop.eup %1991  ;;  %v592_v30 = vmul.f32 %v1990_v28, %v569_v21  ;;  %vm598_vm5 = vweird.f32 %v1990_v28 }
 0x197   : > { %v1994_v31 = vpop.eup %1993  ;;  %v602_v32 = vmul.f32 %v1992_v29, %v570_v24  ;;  %vm608_vm7 = vweird.f32 %v1992_v29  ;;  %vm2391_vm10 = vmor %vm597_vm4, %vm598_vm5 }
 0x198   : > { %v593_v33 = vmul.f32 %v1990_v28, %v592_v30  ;;  %v572_v34 = vmul.f32 %v1994_v31, %v567_v25  ;;  %v1996_v35 = vpop.eup %1995  ;;  %vm578_vm9 = vweird.f32 %v1994_v31  ;;  %vm609_vm12 = vmor %vm607_vm6, %vm608_vm7 }
 0x199   : > { %v603_v36 = vmul.f32 %v1992_v29, %v602_v32  ;;  %v582_v39 = vmul.f32 %v1996_v35, %v568_v27  ;;  %vm588_vm13 = vweird.f32 %v1996_v35  ;;  %vm579_vm14 = vmor %vm577_vm8, %vm578_vm9 }
 0x19a   : > { %v594_v37 = vmul.f32 0.5, %v593_v33  ;;  %v573_v38 = vmul.f32 %v1994_v31, %v572_v34  ;;  %vm589_vm15 = vmor %vm587_vm11, %vm588_vm13 }
 0x19b   : > { %v604_v40 = vmul.f32 0.5, %v603_v36  ;;  %v583_v43 = vmul.f32 %v1996_v35, %v582_v39 }
 0x19c   : > { %v595_v41 = vsub.f32 1.5, %v594_v37  ;;  %v574_v42 = vmul.f32 0.5, %v573_v38 }
 0x19d   : > { %v605_v45 = vsub.f32 1.5, %v604_v40  ;;  %v584_v49 = vmul.f32 0.5, %v583_v43 }
 0x19e   : > { %v596_v47 = vmul.f32 %v1990_v28, %v595_v41  ;;  %v575_v48 = vsub.f32 1.5, %v574_v42 }
 0x19f   : > { %v606_v51 = vmul.f32 %v1992_v29, %v605_v45  ;;  %v585_v55 = vsub.f32 1.5, %v584_v49 }
 0x1a0   : > { %v600_v52 = vsel %vm2391_vm10, %v1990_v28, %v596_v47  ;;  %v576_v54 = vmul.f32 %v1994_v31, %v575_v48 }
 0x1a1   : > { %v613_v56 = vmul.f32 %v600_v52, %v541_v46  ;;  %v610_v57 = vsel %vm609_vm12, %v1992_v29, %v606_v51  ;;  %v586_v61 = vmul.f32 %v1996_v35, %v585_v55 }
 0x1a2   : > { %v614_v58 = vmul.f32 %v610_v57, %v542_v50  ;;  %v580_v59 = vsel %vm579_vm14, %v1994_v31, %v576_v54 }
 0x1a3   : > { %v621_v62 = vmul.f32 %v613_v56, %v2375_v1  ;;  %617 = vst.msk [vmem:[#allocation4 + $0x10] sm:$0xff] %vm506_vm3, %v613_v56  ;;  %v611_v63 = vmul.f32 %v580_v59, %v539_v53  ;;  %v590_v0 = vsel %vm589_vm15, %v1996_v35, %v586_v61 }
 0x1a4   : > { %618 = vst.msk [vmem:[#allocation4 + $0x18] sm:$0xff] %vm506_vm3, %v614_v58  ;;  %v612_v3 = vmul.f32 %v590_v0, %v540_v60  ;;  %v622_v6 = vmul.f32 %v614_v58, %v2377_v5 }
 0x1a5   : > { %631 = vrot.lane.b32.xlu1 %v621_v62, %s2110_s0  ;;  %v619_v2 = vmul.f32 %v611_v63, %v2381_v11  ;;  %615 = vst.msk [vmem:[#allocation4] sm:$0xff] %vm506_vm3, %v611_v63 }
 0x1a6   : > { %616 = vst.msk [vmem:[#allocation4 + $0x8] sm:$0xff] %vm506_vm3, %v612_v3  ;;  %v620_v1 = vmul.f32 %v612_v3, %v2387_v18 }
 0x1a7   : > { %627 = vrot.lane.b32.xlu0 %v619_v2, %s2110_s0 }
 0x1ad   : > { %633 = vrot.lane.b32.xlu1 %v622_v6, %s2110_s0 }
 0x1af   : > { %629 = vrot.lane.b32.xlu0 %v620_v1, %s2110_s0 }
 0x217   : > { %v632_v7 = vpop.permute.xlu1 %631 }
 0x218   : > { %v641_v8 = vsub.f32 %v541_v46, %v632_v7 }
 0x219   : > { %v628_v9 = vpop.permute.xlu0 %627 }
 0x21a   : > { %651 = vrot.lane.b32.xlu0 %v641_v8, %s2111_s27  ;;  %v639_v10 = vsub.f32 %v539_v53, %v628_v9 }
 0x21c   : > { %647 = vrot.lane.b32.xlu2 %v639_v10, %s2111_s27 }
 0x21f   : > { %v634_v11 = vpop.permute.xlu1 %633 }
 0x220   : > { %v642_v12 = vsub.f32 %v542_v50, %v634_v11 }
 0x221   : > { %v630_v13 = vpop.permute.xlu0 %629 }
 0x222   : > { %653 = vrot.lane.b32.xlu1 %v642_v12, %s2111_s27  ;;  %v640_v14 = vsub.f32 %v540_v60, %v630_v13 }
 0x224   : > { %649 = vrot.lane.b32.xlu2 %v640_v14, %s2111_s27 }
 0x276   : > { %v648_v15 = vpop.permute.xlu2 %647 }
 0x277   : > { %659 = vst.msk [vmem:[#allocation5] sm:$0xff] %vm506_vm3, %v648_v15 }
 0x27e   : > { %v650_v5 = vpop.permute.xlu2 %649 }
 0x27f   : > { %660 = vst.msk [vmem:[#allocation5 + $0x8] sm:$0xff] %vm506_vm3, %v650_v5 }
 0x28c   : > { %v652_v16 = vpop.permute.xlu0 %651 }
 0x28d   : > { %661 = vst.msk [vmem:[#allocation5 + $0x10] sm:$0xff] %vm506_vm3, %v652_v16 }
 0x294   : > { %v654_v17 = vpop.permute.xlu1 %653 }
 0x295   : > { %662 = vst.msk [vmem:[#allocation5 + $0x18] sm:$0xff] %vm506_vm3, %v654_v17 }
 0x296 PF: > { %p1716_p4 = scmp.ne.s32.totalorder %s2094_s15, 1 }
 0x297   : > { %s2758_s1 = sld [smem:[#allocation11_spill]] (!%p1716_p4)  ;;  %p1739_p5 = scmp.ne.s32.totalorder (!%p1716_p4), %s2090_s14, 0 }
 0x298   : > { %666 = sbr.rel (%p1716_p4) target bundleno = 1427 (0x593), region = 76  ;;  %s2759_s2 = sld [smem:[#allocation12_spill]] (!%p1716_p4) }
 0x29d   : > { %v686_v18 = vld [vmem:[%s2251_s19 + $0x78] sm:$0xff]  ;;  %vm687_vm1 = vcmask 211968   ;;  %v685_v19 = vld [vmem:[%s2251_s19 + $0x70] sm:$0xff]  ;;  %v684_v20 = vld [vmem:[%s2251_s19 + $0x68] sm:$0xff]  ;;  %v2112_v28 = vmov 0   ;;  %vm839_vm2 = vcmask 261120  }
 0x29e   : > { %1841 = vmatpush.xpose.msk.msra.mxu2 %vm687_vm1, %v686_v18  ;;  %1842 = vmatpush.xpose.msk.msra.mxu3 %vm687_vm1, %v686_v18  ;;  %v683_v21 = vld [vmem:[%s2251_s19 + $0x60] sm:$0xff]  ;;  %v682_v22 = vld [vmem:[%s2251_s19 + $0x58] sm:$0xff]  ;;  %v681_v23 = vld [vmem:[%s2251_s19 + $0x50] sm:$0xff] }
 0x29f   : > { %1717 = vmatpush.xpose.msk.msra.mxu0 %vm687_vm1, %v686_v18  ;;  %v680_v24 = vld [vmem:[%s2251_s19 + $0x48] sm:$0xff]  ;;  %v679_v25 = vld [vmem:[%s2251_s19 + $0x40] sm:$0xff]  ;;  %v780_v26 = vld [vmem:[#allocation4 + $0x18] sm:$0xff]  ;;  %1997 = vset.pattern.permute.xlu0 %v2112_v28 }
 0x2a0   : > { %v678_v27 = vld [vmem:[%s2251_s19 + $0x38] sm:$0xff]  ;;  %802 = vperm.xlu0 %1997, %v780_v26   ;;  %1998 = vset.pattern.permute.xlu1 %v2112_v28  ;;  %v677_v30 = vld [vmem:[%s2251_s19 + $0x30] sm:$0xff]  ;;  %v676_v32 = vld [vmem:[%s2251_s19 + $0x28] sm:$0xff] }
 0x2a1   : > { %v784_v29 = vld [vmem:[#allocation5 + $0x18] sm:$0xff]  ;;  %1999 = vset.pattern.permute.xlu2 %v2112_v28  ;;  %v779_v31 = vld [vmem:[#allocation4 + $0x10] sm:$0xff]  ;;  %v778_v33 = vld [vmem:[#allocation4 + $0x8] sm:$0xff] }
 0x2a2   : > { %1843 = vmatpush.xpose.msk.msra.mxu2 %vm687_vm1, %v685_v19  ;;  %1844 = vmatpush.xpose.msk.msra.mxu3 %vm687_vm1, %v685_v19  ;;  %v783_v34 = vld [vmem:[#allocation5 + $0x10] sm:$0xff]  ;;  %v675_v35 = vld [vmem:[%s2251_s19 + $0x20] sm:$0xff]  ;;  %v782_v36 = vld [vmem:[#allocation5 + $0x8] sm:$0xff] }
 0x2a3   : > { %1718 = vmatpush.xpose.msk.msra.mxu0 %vm687_vm1, %v685_v19  ;;  %826 = vperm.xlu1 %1998, %v784_v29   ;;  %v674_v37 = vld [vmem:[%s2251_s19 + $0x18] sm:$0xff]  ;;  %v781_v38 = vld [vmem:[#allocation5] sm:$0xff]  ;;  %v673_v40 = vld [vmem:[%s2251_s19 + $0x10] sm:$0xff] }
 0x2a4   : > { %821 = vperm.xlu2 %1999, %v783_v34   ;;  %v777_v39 = vld [vmem:[#allocation4] sm:$0xff]  ;;  %v672_v41 = vld [vmem:[%s2251_s19 + $0x8] sm:$0xff]  ;;  %v669_v44 = vld [vmem:[%s2758_s1 + $0x10] sm:$0xff] }
 0x2a5   : > { %v671_v42 = vld [vmem:[%s2251_s19] sm:$0xff]  ;;  %v668_v43 = vld [vmem:[%s2758_s1 + $0x8] sm:$0xff]  ;;  %v670_v46 = vld [vmem:[%s2758_s1 + $0x18] sm:$0xff] }
 0x2a6   : > { %1845 = vmatpush.xpose.msk.msra.mxu2 %vm687_vm1, %v684_v20  ;;  %1846 = vmatpush.xpose.msk.msra.mxu3 %vm687_vm1, %v684_v20  ;;  %v667_v45 = vld [vmem:[%s2758_s1] sm:$0xff]  ;;  %v838_v10 = vld [vmem:[%s2759_s2 + $0x8] sm:$0xff] }
 0x2a7   : > { %1719 = vmatpush.xpose.msk.msra.mxu0 %vm687_vm1, %v684_v20  ;;  %v837_v9 = vld [vmem:[%s2759_s2] sm:$0xff] }
 0x2a8   : > { %797 = vperm.xlu0 %1997, %v779_v31  }
 0x2aa   : > { %1847 = vmatpush.xpose.msk.msra.mxu2 %vm687_vm1, %v683_v21  ;;  %1848 = vmatpush.xpose.msk.msra.mxu3 %vm687_vm1, %v683_v21 }
 0x2ab   : > { %1720 = vmatpush.xpose.msk.msra.mxu0 %vm687_vm1, %v683_v21  ;;  %792 = vperm.xlu1 %1998, %v778_v33  }
 0x2ac   : > { %787 = vperm.xlu2 %1999, %v777_v39  }
 0x2ae   : > { %1849 = vmatpush.xpose.msk.msra.mxu2 %vm687_vm1, %v682_v22  ;;  %1850 = vmatpush.xpose.msk.msra.mxu3 %vm687_vm1, %v682_v22 }
 0x2af   : > { %1721 = vmatpush.xpose.msk.msra.mxu0 %vm687_vm1, %v682_v22 }
 0x2b0   : > { %816 = vperm.xlu0 %1997, %v782_v36  }
 0x2b2   : > { %1851 = vmatpush.xpose.msk.msra.mxu2 %vm687_vm1, %v681_v23  ;;  %1852 = vmatpush.xpose.msk.msra.mxu3 %vm687_vm1, %v681_v23 }
 0x2b3   : > { %1722 = vmatpush.xpose.msk.msra.mxu0 %vm687_vm1, %v681_v23  ;;  %811 = vperm.xlu1 %1998, %v781_v38  }
 0x2b6   : > { %1853 = vmatpush.xpose.msk.msra.mxu2 %vm687_vm1, %v680_v24  ;;  %1854 = vmatpush.xpose.msk.msra.mxu3 %vm687_vm1, %v680_v24 }
 0x2b7   : > { %1723 = vmatpush.xpose.msk.msra.mxu0 %vm687_vm1, %v680_v24 }
 0x2ba   : > { %1855 = vmatpush.xpose.msk.msra.mxu2 %vm687_vm1, %v679_v25  ;;  %1856 = vmatpush.xpose.msk.msra.mxu3 %vm687_vm1, %v679_v25 }
 0x2bb   : > { %1724 = vmatpush.xpose.msk.msra.mxu0 %vm687_vm1, %v679_v25 }
 0x2be   : > { %1857 = vmatpush.xpose.msk.msra.mxu2 %vm687_vm1, %v678_v27  ;;  %1858 = vmatpush.xpose.msk.msra.mxu3 %vm687_vm1, %v678_v27 }
 0x2bf   : > { %1725 = vmatpush.xpose.msk.msra.mxu0 %vm687_vm1, %v678_v27 }
 0x2c2   : > { %1859 = vmatpush.xpose.msk.msra.mxu2 %vm687_vm1, %v677_v30  ;;  %1860 = vmatpush.xpose.msk.msra.mxu3 %vm687_vm1, %v677_v30 }
 0x2c3   : > { %1726 = vmatpush.xpose.msk.msra.mxu0 %vm687_vm1, %v677_v30 }
 0x2c6   : > { %1861 = vmatpush.xpose.msk.msra.mxu2 %vm687_vm1, %v676_v32  ;;  %1862 = vmatpush.xpose.msk.msra.mxu3 %vm687_vm1, %v676_v32 }
 0x2c7   : > { %1727 = vmatpush.xpose.msk.msra.mxu0 %vm687_vm1, %v676_v32 }
 0x2ca   : > { %1863 = vmatpush.xpose.msk.msra.mxu2 %vm687_vm1, %v675_v35  ;;  %1864 = vmatpush.xpose.msk.msra.mxu3 %vm687_vm1, %v675_v35 }
 0x2cb   : > { %1728 = vmatpush.xpose.msk.msra.mxu0 %vm687_vm1, %v675_v35 }
 0x2ce   : > { %1865 = vmatpush.xpose.msk.msra.mxu2 %vm687_vm1, %v674_v37  ;;  %1866 = vmatpush.xpose.msk.msra.mxu3 %vm687_vm1, %v674_v37 }
 0x2cf   : > { %1729 = vmatpush.xpose.msk.msra.mxu0 %vm687_vm1, %v674_v37 }
 0x2d2   : > { %1867 = vmatpush.xpose.msk.msra.mxu2 %vm687_vm1, %v673_v40  ;;  %1868 = vmatpush.xpose.msk.msra.mxu3 %vm687_vm1, %v673_v40 }
 0x2d3   : > { %1730 = vmatpush.xpose.msk.msra.mxu0 %vm687_vm1, %v673_v40 }
 0x2d6   : > { %1869 = vmatpush.xpose.msk.msra.mxu2 %vm687_vm1, %v672_v41  ;;  %1870 = vmatpush.xpose.msk.msra.mxu3 %vm687_vm1, %v672_v41 }
 0x2d7   : > { %1731 = vmatpush.xpose.msk.msra.mxu0 %vm687_vm1, %v672_v41 }
 0x2da   : > { %1871 = vmatpush.xpose.msk.msra.mxu2 %vm687_vm1, %v671_v42  ;;  %1872 = vmatpush.xpose.msk.msra.mxu3 %vm687_vm1, %v671_v42 }
 0x2db   : > { %1732 = vmatpush.xpose.msk.msra.mxu0 %vm687_vm1, %v671_v42 }
 0x2dd   : > { %1734 = vmatmul.msk.f32.vlgmr.msra.gmra.mxu2 %vm687_vm1, %v668_v43  ;;  %1735 = vmatmul.msk.f32.vlgmr.msra.gmra.mxu3 %vm687_vm1, %v669_v44 }
 0x2de   : > { %1733 = vmatmul.msk.f32.vlgmr.msra.gmra.mxu0 %vm687_vm1, %v667_v45 }
 0x2e5   : > { %1736 = vmatmul.msk.f32.gmra.mxu3 %vm687_vm1, %v670_v46 }
 0x2fe   : > { %v822_v49 = vpop.permute.xlu2 %821 }
 0x306   : > { %v788_v54 = vpop.permute.xlu2 %787 }
 0x312   : > { %v803_v47 = vpop.permute.xlu0 %802 }
 0x315   : > { %v827_v48 = vpop.permute.xlu1 %826 }
 0x31a   : > { %v798_v51 = vpop.permute.xlu0 %797 }
 0x31d   : > { %v793_v52 = vpop.permute.xlu1 %792 }
 0x322   : > { %v817_v63 = vpop.permute.xlu0 %816 }
 0x325   : > { %v812_v0 = vpop.permute.xlu1 %811 }
 0x35b   : > { %v765_v56 = vpop.f32.mrf.mxu0 }
 0x35c   : > { %v805_v60 = vmul.f32 %v788_v54, %v765_v56 }
 0x35e   : > { %v829_v6 = vadd.f32 %v812_v0, %v805_v60 }
 0x360   : > { %v771_v50 = vpop.f32.mrf.mxu3  ;;  %v768_v53 = vpop.f32.mrf.mxu2  ;;  %v833_v8 = vmax.f32 %v829_v6, 0.0 }
 0x361   : > { %v807_v55 = vmul.f32 %v798_v51, %v771_v50  ;;  %v806_v58 = vmul.f32 %v793_v52, %v768_v53 }
 0x363   : > { %v831_v62 = vadd.f32 %v822_v49, %v807_v55  ;;  %v830_v3 = vadd.f32 %v817_v63, %v806_v58 }
 0x365   : > { %v835_v1 = vmax.f32 %v831_v62, 0.0  ;;  %v834_v7 = vmax.f32 %v830_v3, 0.0 }
 0x368   : > { %v774_v57 = vpop.f32.mrf.mxu3 }
 0x369   : > { %v808_v59 = vmul.f32 %v803_v47, %v774_v57 }
 0x36b   : > { %v832_v61 = vadd.f32 %v827_v48, %v808_v59 }
 0x36d   : > { %v836_v2 = vmax.f32 %v832_v61, 0.0 }
 0x36f   : > { %858 = vmatpush.msra.mxu1 %v836_v2 }
 0x371   : > { %859 = vmatpush.msra.mxu1 %v835_v1 }
 0x373   : > { %860 = vmatpush.msra.mxu1 %v834_v7 }
 0x375   : > { %861 = vmatpush.msra.mxu1 %v833_v8 }
 0x376   : > { %1737 = vmatmul.msk.f32.vlgmr.msra.gmra.mxu1 %vm839_vm2, %v837_v9 }
 0x37e   : > { %1738 = vmatmul.msk.f32.gmra.mxu1 %vm839_vm2, %v838_v10 }
 0x3f3   : > { %v863_v11 = vpop.f32.mrf.mxu1 }
 0x3f4   : > { %v871_v12 = vsel %vm351_vm0, %v863_v11, 0.0 }
 0x3f8   : > { %876 = sbr.rel (%p1739_p5) target bundleno = 1026 (0x402), region = 80 }
 0x3fb   : > { %v866_v13 = vpop.f32.mrf.mxu1 }
 0x3fc   : > { %v872_v14 = vsel %vm351_vm0, %v866_v13, 0.0 }
 0x3fd   : > { %vm878_vm3 = vcmask 7168   ;;  %v2113_v15 = vmov 0.0  }
 0x3fe   : > { %879 = vst.msk [vmem:[#allocation2 + $0x20] sm:$0xff] %vm878_vm3, %v2113_v15 }
 0x3ff   : > { %880 = vst.msk [vmem:[#allocation2 + $0x28] sm:$0xff] %vm878_vm3, %v2113_v15 }
 0x400   : > { %882 = vst.msk [vmem:[#allocation3 + $0x20] sm:$0xff] %vm878_vm3, %v2113_v15 }
 0x401   : > { %883 = vst.msk [vmem:[#allocation3 + $0x28] sm:$0xff] %vm878_vm3, %v2113_v15 }
 0x402 PF: > { %887 = vadd.xlane.f32.xlu0 %v871_v12  ;;  %v899_v5 = vmul.f32 %v871_v12, %v871_v12  ;;  %v900_v16 = vmul.f32 %v872_v14, %v872_v14  ;;  %vm893_vm4 = vcmask 7168   ;;  %p1740_p6 = scmp.ne.s32.totalorder %s2090_s14, 1 }
 0x403   : > { %s2114_s23 = smov (!%p1740_p6), 1   ;;  %s2115_s28 = smov (!%p1740_p6), 127  }
 0x404   : > { %901 = vadd.xlane.f32.xlu1 %v899_v5 }
 0x405   : > { %v885_v17 = vld [vmem:[#allocation2 + $0x20] sm:$0xff] }
 0x406   : > { %v886_v23 = vld [vmem:[#allocation2 + $0x28] sm:$0xff] }
 0x407   : > { %v897_v19 = vld [vmem:[#allocation3 + $0x20] sm:$0xff] }
 0x408   : > { %v898_v25 = vld [vmem:[#allocation3 + $0x28] sm:$0xff] }
 0x40a   : > { %889 = vadd.xlane.f32.xlu0 %v872_v14 }
 0x40c   : > { %903 = vadd.xlane.f32.xlu1 %v900_v16 }
 0x475   : > { %v888_v18 = vpop.xlane.xlu0 %887 }
 0x476   : > { %v891_v20 = vadd.f32 %v888_v18, %v885_v17 }
 0x477   : > { %v902_v21 = vpop.xlane.xlu1 %901 }
 0x478   : > { %894 = vst.msk [vmem:[#allocation2 + $0x20] sm:$0xff] %vm893_vm4, %v891_v20  ;;  %v905_v22 = vadd.f32 %v902_v21, %v897_v19 }
 0x47a   : > { %907 = vst.msk [vmem:[#allocation3 + $0x20] sm:$0xff] %vm893_vm4, %v905_v22 }
 0x47d   : > { %v890_v24 = vpop.xlane.xlu0 %889 }
 0x47e   : > { %v892_v26 = vadd.f32 %v890_v24, %v886_v23  ;;  %912 = sbr.rel (%p1740_p6) target bundleno = 1427 (0x593), region = 84 }
 0x47f   : > { %v904_v27 = vpop.xlane.xlu1 %903 }
 0x480   : > { %895 = vst.msk [vmem:[#allocation2 + $0x28] sm:$0xff] %vm893_vm4, %v892_v26  ;;  %v906_v28 = vadd.f32 %v904_v27, %v898_v25 }
 0x482   : > { %908 = vst.msk [vmem:[#allocation3 + $0x28] sm:$0xff] %vm893_vm4, %v906_v28 }
 0x483   : > { %v915_v29 = vld [vmem:[#allocation2 + $0x20] sm:$0xff]  ;;  %v914_v55 = vld [vmem:[%s2744_s6 + $0x8] sm:$0xff] }
 0x484   : > { %v919_v30 = vld [vmem:[#allocation3 + $0x20] sm:$0xff]  ;;  %v917_v31 = vmul.f32 0.005, %v915_v29 }
 0x485   : > { %v921_v32 = vmul.f32 0.005, %v919_v30  ;;  %v913_v53 = vld [vmem:[%s2744_s6] sm:$0xff] }
 0x486   : > { %v923_v36 = vmul.f32 %v917_v31, %v917_v31 }
 0x487   : > { %v916_v33 = vld [vmem:[#allocation2 + $0x28] sm:$0xff] }
 0x488   : > { %v918_v34 = vmul.f32 0.005, %v916_v33  ;;  %v925_v39 = vsub.f32 %v921_v32, %v923_v36 }
 0x489   : > { %v920_v35 = vld [vmem:[#allocation3 + $0x28] sm:$0xff] }
 0x48a   : > { %v922_v37 = vmul.f32 0.005, %v920_v35  ;;  %v924_v38 = vmul.f32 %v918_v34, %v918_v34  ;;  %v927_v41 = vadd.f32 1e-05, %v925_v39 }
 0x48c   : > { %v926_v40 = vsub.f32 %v922_v37, %v924_v38  ;;  %2000 = vrsqrt.f32 %v927_v41  ;;  %vm935_vm5 = vweird.f32 %v927_v41 }
 0x48e   : > { %v928_v42 = vadd.f32 1e-05, %v926_v40 }
 0x490   : > { %2002 = vrsqrt.f32 %v928_v42  ;;  %vm945_vm7 = vweird.f32 %v928_v42 }
 0x492   : > { %v2001_v43 = vpop.eup %2000 }
 0x493   : > { %v930_v45 = vmul.f32 %v2001_v43, %v927_v41  ;;  %vm936_vm6 = vweird.f32 %v2001_v43 }
 0x494   : > { %vm937_vm9 = vmor %vm935_vm5, %vm936_vm6 }
 0x495   : > { %v931_v47 = vmul.f32 %v2001_v43, %v930_v45 }
 0x496   : > { %v2003_v44 = vpop.eup %2002 }
 0x497   : > { %v940_v46 = vmul.f32 %v2003_v44, %v928_v42  ;;  %v932_v49 = vmul.f32 0.5, %v931_v47  ;;  %vm946_vm8 = vweird.f32 %v2003_v44 }
 0x498   : > { %vm947_vm10 = vmor %vm945_vm7, %vm946_vm8 }
 0x499   : > { %v941_v48 = vmul.f32 %v2003_v44, %v940_v46  ;;  %v933_v51 = vsub.f32 1.5, %v932_v49 }
 0x49b   : > { %v942_v50 = vmul.f32 0.5, %v941_v48  ;;  %v934_v54 = vmul.f32 %v2001_v43, %v933_v51 }
 0x49d   : > { %v943_v52 = vsub.f32 1.5, %v942_v50  ;;  %v938_v57 = vsel %vm937_vm9, %v2001_v43, %v934_v54 }
 0x49e   : > { %v949_v58 = vmul.f32 %v938_v57, %v913_v53 }
 0x49f   : > { %v944_v56 = vmul.f32 %v2003_v44, %v943_v52 }
 0x4a0   : > { %v954_v61 = vmul.f32 %v949_v58, %v917_v31  ;;  %952 = vst.msk [vmem:[#allocation4 + $0x20] sm:$0xff] %vm893_vm4, %v949_v58 }
 0x4a1   : > { %v948_v59 = vsel %vm947_vm10, %v2003_v44, %v944_v56 }
 0x4a2   : > { %v950_v60 = vmul.f32 %v948_v59, %v914_v55  ;;  %958 = vrot.lane.b32.xlu0 %v954_v61, %s2114_s23 }
 0x4a4   : > { %953 = vst.msk [vmem:[#allocation4 + $0x28] sm:$0xff] %vm893_vm4, %v950_v60  ;;  %v955_v62 = vmul.f32 %v950_v60, %v918_v34 }
 0x4aa   : > { %960 = vrot.lane.b32.xlu0 %v955_v62, %s2114_s23 }
 0x514   : > { %v959_v63 = vpop.permute.xlu0 %958 }
 0x515   : > { %v964_v0 = vsub.f32 %v913_v53, %v959_v63 }
 0x517   : > { %968 = vrot.lane.b32.xlu1 %v964_v0, %s2115_s28 }
 0x51c   : > { %v961_v2 = vpop.permute.xlu0 %960 }
 0x51d   : > { %v965_v3 = vsub.f32 %v914_v55, %v961_v2 }
 0x51f   : > { %970 = vrot.lane.b32.xlu1 %v965_v3, %s2115_s28 }
 0x589   : > { %v969_v6 = vpop.permute.xlu1 %968 }
 0x58a   : > { %975 = vst.msk [vmem:[#allocation5 + $0x20] sm:$0xff] %vm893_vm4, %v969_v6 }
 0x591   : > { %v971_v1 = vpop.permute.xlu1 %970 }
 0x592   : > { %976 = vst.msk [vmem:[#allocation5 + $0x28] sm:$0xff] %vm893_vm4, %v971_v1 }
 0x593 PF: > { %p1741_p7 = scmp.ne.s32.totalorder %s2094_s15, 2 }
 0x594   : > { %s2760_s1 = sld [smem:[#allocation11_spill]] (!%p1741_p7)  ;;  %p1765_p9 = scmp.ne.s32.totalorder (!%p1741_p7), %s2090_s14, 0 }
 0x595   : > { %980 = sbr.rel (%p1741_p7) target bundleno = 2333 (0x91d), region = 88  ;;  %s2761_s2 = sld [smem:[#allocation12_spill]] (!%p1741_p7) }
 0x59a   : > { %v1000_v7 = vld [vmem:[%s2251_s19 + $0x78] sm:$0xff]  ;;  %vm1001_vm11 = vcmask 211968   ;;  %v999_v8 = vld [vmem:[%s2251_s19 + $0x70] sm:$0xff]  ;;  %v998_v9 = vld [vmem:[%s2251_s19 + $0x68] sm:$0xff]  ;;  %v2116_v16 = vmov 0   ;;  %vm1153_vm12 = vcmask 261120  }
 0x59b   : > { %1873 = vmatpush.xpose.msk.msra.mxu3 %vm1001_vm11, %v1000_v7  ;;  %1742 = vmatpush.xpose.msk.msra.mxu0 %vm1001_vm11, %v1000_v7  ;;  %v997_v10 = vld [vmem:[%s2251_s19 + $0x60] sm:$0xff]  ;;  %v996_v11 = vld [vmem:[%s2251_s19 + $0x58] sm:$0xff]  ;;  %v995_v12 = vld [vmem:[%s2251_s19 + $0x50] sm:$0xff]  ;;  %vm1216_vm13 = vcmask 130048  }
 0x59c   : > { %v994_v13 = vld [vmem:[%s2251_s19 + $0x48] sm:$0xff]  ;;  %v993_v14 = vld [vmem:[%s2251_s19 + $0x40] sm:$0xff]  ;;  %v1094_v15 = vld [vmem:[#allocation4 + $0x18] sm:$0xff]  ;;  %2004 = vset.pattern.permute.xlu0 %v2116_v16  ;;  %2005 = vset.pattern.permute.xlu1 %v2116_v16 }
 0x59d   : > { %v992_v5 = vld [vmem:[%s2251_s19 + $0x38] sm:$0xff]  ;;  %1116 = vperm.xlu0 %2004, %v1094_v15   ;;  %2006 = vset.pattern.permute.xlu2 %v2116_v16  ;;  %v991_v18 = vld [vmem:[%s2251_s19 + $0x30] sm:$0xff]  ;;  %v990_v20 = vld [vmem:[%s2251_s19 + $0x28] sm:$0xff] }
 0x59e   : > { %v1098_v17 = vld [vmem:[#allocation5 + $0x18] sm:$0xff]  ;;  %v1093_v19 = vld [vmem:[#allocation4 + $0x10] sm:$0xff]  ;;  %v1092_v21 = vld [vmem:[#allocation4 + $0x8] sm:$0xff] }
 0x59f   : > { %1874 = vmatpush.xpose.msk.msra.mxu3 %vm1001_vm11, %v999_v8  ;;  %1743 = vmatpush.xpose.msk.msra.mxu0 %vm1001_vm11, %v999_v8  ;;  %v989_v22 = vld [vmem:[%s2251_s19 + $0x20] sm:$0xff]  ;;  %v1096_v23 = vld [vmem:[#allocation5 + $0x8] sm:$0xff]  ;;  %v988_v24 = vld [vmem:[%s2251_s19 + $0x18] sm:$0xff] }
 0x5a0   : > { %1140 = vperm.xlu1 %2005, %v1098_v17   ;;  %v1095_v25 = vld [vmem:[#allocation5] sm:$0xff]  ;;  %v1097_v26 = vld [vmem:[#allocation5 + $0x10] sm:$0xff]  ;;  %v986_v29 = vld [vmem:[%s2251_s19 + $0x8] sm:$0xff] }
 0x5a1   : > { %v987_v27 = vld [vmem:[%s2251_s19 + $0x10] sm:$0xff]  ;;  %1135 = vperm.xlu2 %2006, %v1097_v26   ;;  %v1184_v28 = vld [vmem:[#allocation4 + $0x20] sm:$0xff]  ;;  %v1188_v30 = vld [vmem:[#allocation5 + $0x28] sm:$0xff] }
 0x5a2   : > { %v1091_v31 = vld [vmem:[#allocation4] sm:$0xff]  ;;  %v982_v33 = vld [vmem:[%s2760_s1 + $0x8] sm:$0xff]  ;;  %v983_v36 = vld [vmem:[%s2760_s1 + $0x10] sm:$0xff] }
 0x5a3   : > { %1875 = vmatpush.xpose.msk.msra.mxu3 %vm1001_vm11, %v998_v9  ;;  %1744 = vmatpush.xpose.msk.msra.mxu0 %vm1001_vm11, %v998_v9  ;;  %v985_v32 = vld [vmem:[%s2251_s19] sm:$0xff]  ;;  %v1185_v35 = vld [vmem:[#allocation4 + $0x28] sm:$0xff]  ;;  %v984_v38 = vld [vmem:[%s2760_s1 + $0x18] sm:$0xff] }
 0x5a4   : > { %v981_v34 = vld [vmem:[%s2760_s1] sm:$0xff]  ;;  %v1152_v0 = vld [vmem:[%s2761_s2 + $0x8] sm:$0xff] }
 0x5a5   : > { %1111 = vperm.xlu0 %2004, %v1093_v19   ;;  %v1187_v37 = vld [vmem:[#allocation5 + $0x20] sm:$0xff] }
 0x5a6   : > { %v1151_v63 = vld [vmem:[%s2761_s2] sm:$0xff] }
 0x5a7   : > { %1876 = vmatpush.xpose.msk.msra.mxu3 %vm1001_vm11, %v997_v10  ;;  %1745 = vmatpush.xpose.msk.msra.mxu0 %vm1001_vm11, %v997_v10  ;;  %v1215_v15 = vld [vmem:[%s2741_s3] sm:$0xff] }
 0x5a8   : > { %1106 = vperm.xlu1 %2005, %v1092_v21  }
 0x5a9   : > { %1101 = vperm.xlu2 %2006, %v1091_v31  }
 0x5ab   : > { %1877 = vmatpush.xpose.msk.msra.mxu3 %vm1001_vm11, %v996_v11  ;;  %1746 = vmatpush.xpose.msk.msra.mxu0 %vm1001_vm11, %v996_v11 }
 0x5ad   : > { %1130 = vperm.xlu0 %2004, %v1096_v23  }
 0x5af   : > { %1878 = vmatpush.xpose.msk.msra.mxu3 %vm1001_vm11, %v995_v12  ;;  %1747 = vmatpush.xpose.msk.msra.mxu0 %vm1001_vm11, %v995_v12 }
 0x5b0   : > { %1125 = vperm.xlu1 %2005, %v1095_v25  }
 0x5b1   : > { %1196 = vperm.xlu2 %2006, %v1185_v35  }
 0x5b3   : > { %1879 = vmatpush.xpose.msk.msra.mxu3 %vm1001_vm11, %v994_v13  ;;  %1748 = vmatpush.xpose.msk.msra.mxu0 %vm1001_vm11, %v994_v13 }
 0x5b5   : > { %1191 = vperm.xlu0 %2004, %v1184_v28  }
 0x5b7   : > { %1880 = vmatpush.xpose.msk.msra.mxu3 %vm1001_vm11, %v993_v14  ;;  %1749 = vmatpush.xpose.msk.msra.mxu0 %vm1001_vm11, %v993_v14 }
 0x5b8   : > { %1208 = vperm.xlu1 %2005, %v1188_v30  }
 0x5b9   : > { %1203 = vperm.xlu2 %2006, %v1187_v37  }
 0x5bb   : > { %1881 = vmatpush.xpose.msk.msra.mxu3 %vm1001_vm11, %v992_v5  ;;  %1750 = vmatpush.xpose.msk.msra.mxu0 %vm1001_vm11, %v992_v5 }
 0x5bf   : > { %1882 = vmatpush.xpose.msk.msra.mxu3 %vm1001_vm11, %v991_v18  ;;  %1751 = vmatpush.xpose.msk.msra.mxu0 %vm1001_vm11, %v991_v18 }
 0x5c3   : > { %1883 = vmatpush.xpose.msk.msra.mxu3 %vm1001_vm11, %v990_v20  ;;  %1752 = vmatpush.xpose.msk.msra.mxu0 %vm1001_vm11, %v990_v20 }
 0x5c7   : > { %1884 = vmatpush.xpose.msk.msra.mxu3 %vm1001_vm11, %v989_v22  ;;  %1753 = vmatpush.xpose.msk.msra.mxu0 %vm1001_vm11, %v989_v22 }
 0x5cb   : > { %1885 = vmatpush.xpose.msk.msra.mxu3 %vm1001_vm11, %v988_v24  ;;  %1754 = vmatpush.xpose.msk.msra.mxu0 %vm1001_vm11, %v988_v24 }
 0x5cf   : > { %1886 = vmatpush.xpose.msk.msra.mxu3 %vm1001_vm11, %v987_v27  ;;  %1755 = vmatpush.xpose.msk.msra.mxu0 %vm1001_vm11, %v987_v27 }
 0x5d3   : > { %1887 = vmatpush.xpose.msk.msra.mxu3 %vm1001_vm11, %v986_v29  ;;  %1756 = vmatpush.xpose.msk.msra.mxu0 %vm1001_vm11, %v986_v29 }
 0x5d7   : > { %1888 = vmatpush.xpose.msk.msra.mxu3 %vm1001_vm11, %v985_v32  ;;  %1757 = vmatpush.xpose.msk.msra.mxu0 %vm1001_vm11, %v985_v32 }
 0x5da   : > { %1759 = vmatmul.msk.f32.vlgmr.msra.gmra.mxu3 %vm1001_vm11, %v982_v33  ;;  %1758 = vmatmul.msk.f32.vlgmr.msra.gmra.mxu0 %vm1001_vm11, %v981_v34 }
 0x5e2   : > { %1760 = vmatmul.msk.f32.gmra.mxu3 %vm1001_vm11, %v983_v36 }
 0x5ea   : > { %1761 = vmatmul.msk.f32.gmra.mxu3 %vm1001_vm11, %v984_v38 }
 0x5fb   : > { %v1136_v42 = vpop.permute.xlu2 %1135 }
 0x603   : > { %v1102_v51 = vpop.permute.xlu2 %1101 }
 0x60b   : > { %v1197_v2 = vpop.permute.xlu2 %1196 }
 0x60f   : > { %v1117_v39 = vpop.permute.xlu0 %1116 }
 0x612   : > { %v1141_v41 = vpop.permute.xlu1 %1140 }
 0x613   : > { %v1204_v10 = vpop.permute.xlu2 %1203 }
 0x617   : > { %v1112_v44 = vpop.permute.xlu0 %1111 }
 0x61a   : > { %v1107_v45 = vpop.permute.xlu1 %1106 }
 0x61f   : > { %v1131_v55 = vpop.permute.xlu0 %1130 }
 0x622   : > { %v1126_v58 = vpop.permute.xlu1 %1125 }
 0x627   : > { %v1192_v6 = vpop.permute.xlu0 %1191 }
 0x62a   : > { %v1209_v9 = vpop.permute.xlu1 %1208 }
 0x657   : > { %v1079_v47 = vpop.f32.mrf.mxu0 }
 0x658   : > { %v1119_v52 = vmul.f32 %v1102_v51, %v1079_v47 }
 0x65a   : > { %v1143_v60 = vadd.f32 %v1126_v58, %v1119_v52 }
 0x65c   : > { %v1147_v62 = vmax.f32 %v1143_v60, 0.0 }
 0x65d   : > { %v1082_v40 = vpop.f32.mrf.mxu3 }
 0x65e   : > { %v1120_v49 = vmul.f32 %v1107_v45, %v1082_v40 }
 0x660   : > { %v1144_v57 = vadd.f32 %v1131_v55, %v1120_v49 }
 0x662   : > { %v1148_v61 = vmax.f32 %v1144_v57, 0.0 }
 0x665   : > { %v1085_v43 = vpop.f32.mrf.mxu3 }
 0x666   : > { %v1121_v46 = vmul.f32 %v1112_v44, %v1085_v43 }
 0x668   : > { %v1145_v54 = vadd.f32 %v1136_v42, %v1121_v46 }
 0x66a   : > { %v1149_v59 = vmax.f32 %v1145_v54, 0.0 }
 0x66d   : > { %v1088_v48 = vpop.f32.mrf.mxu3 }
 0x66e   : > { %v1122_v50 = vmul.f32 %v1117_v39, %v1088_v48 }
 0x670   : > { %v1146_v53 = vadd.f32 %v1141_v41, %v1122_v50 }
 0x672   : > { %v1150_v56 = vmax.f32 %v1146_v53, 0.0 }
 0x674   : > { %1172 = vmatpush.msra.mxu1 %v1150_v56 }
 0x676   : > { %1173 = vmatpush.msra.mxu1 %v1149_v59 }
 0x678   : > { %1174 = vmatpush.msra.mxu1 %v1148_v61 }
 0x67a   : > { %1175 = vmatpush.msra.mxu1 %v1147_v62 }
 0x67b   : > { %1762 = vmatmul.msk.f32.vlgmr.msra.gmra.mxu1 %vm1153_vm12, %v1151_v63 }
 0x683   : > { %1763 = vmatmul.msk.f32.gmra.mxu1 %vm1153_vm12, %v1152_v0 }
 0x6f8   : > { %v1177_v3 = vpop.f32.mrf.mxu1 }
 0x6f9   : > { %v1199_v1 = vmul.f32 %v1192_v6, %v1177_v3 }
 0x6fb   : > { %v1211_v12 = vadd.f32 %v1204_v10, %v1199_v1 }
 0x6fd   : > { %v1213_v14 = vmax.f32 %v1211_v12, 0.0 }
 0x700   : > { %v1180_v7 = vpop.f32.mrf.mxu1 }
 0x701   : > { %v1200_v8 = vmul.f32 %v1197_v2, %v1180_v7 }
 0x703   : > { %v1212_v11 = vadd.f32 %v1209_v9, %v1200_v8 }
 0x705   : > { %v1214_v13 = vmax.f32 %v1212_v11, 0.0 }
 0x707   : > { %1234 = vmatpush.msra.mxu2 %v1214_v13 }
 0x709   : > { %1235 = vmatpush.msra.mxu2 %v1213_v14 }
 0x70a   : > { %1764 = vmatmul.msk.f32.vlgmr.msra.gmra.mxu2 %vm1216_vm13, %v1215_v15 }
 0x78a   : > { %1246 = sbr.rel (%p1765_p9) target bundleno = 1938 (0x792), region = 92 }
 0x78d   : > { %v1237_v5 = vpop.f32.mrf.mxu2 }
 0x78e   : > { %v1242_v16 = vsel %vm351_vm0, %v1237_v5, 0.0 }
 0x78f   : > { %vm1248_vm14 = vcmask 7168   ;;  %v2117_v17 = vmov 0.0  }
 0x790   : > { %1249 = vst.msk [vmem:[#allocation2 + $0x40] sm:$0xff] %vm1248_vm14, %v2117_v17 }
 0x791   : > { %1251 = vst.msk [vmem:[#allocation3 + $0x40] sm:$0xff] %vm1248_vm14, %v2117_v17 }
 0x792 PF: > { %1254 = vadd.xlane.f32.xlu0 %v1242_v16  ;;  %v1261_v18 = vmul.f32 %v1242_v16, %v1242_v16  ;;  %vm1257_vm15 = vcmask 7168   ;;  %p1766_p10 = scmp.ne.s32.totalorder %s2090_s14, 1 }
 0x793   : > { %s2118_s29 = smov (!%p1766_p10), 1   ;;  %s2119_s30 = smov (!%p1766_p10), 127  }
 0x797   : > { %v1253_v19 = vld [vmem:[#allocation2 + $0x40] sm:$0xff] }
 0x798   : > { %v1260_v22 = vld [vmem:[#allocation3 + $0x40] sm:$0xff] }
 0x79a   : > { %1262 = vadd.xlane.f32.xlu0 %v1261_v18 }
 0x805   : > { %v1255_v20 = vpop.xlane.xlu0 %1254 }
 0x806   : > { %v1256_v21 = vadd.f32 %v1255_v20, %v1253_v19 }
 0x808   : > { %1258 = vst.msk [vmem:[#allocation2 + $0x40] sm:$0xff] %vm1257_vm15, %v1256_v21 }
 0x80c   : > { %1269 = sbr.rel (%p1766_p10) target bundleno = 2333 (0x91d), region = 96 }
 0x80d   : > { %v1263_v4 = vpop.xlane.xlu0 %1262 }
 0x80e   : > { %v1264_v23 = vadd.f32 %v1263_v4, %v1260_v22 }
 0x810   : > { %1265 = vst.msk [vmem:[#allocation3 + $0x40] sm:$0xff] %vm1257_vm15, %v1264_v23 }
 0x811   : > { %v1271_v24 = vld [vmem:[#allocation2 + $0x40] sm:$0xff] }
 0x812   : > { %v1272_v26 = vmul.f32 0.005, %v1271_v24  ;;  %v1270_v36 = vld [vmem:[%s2745_s7] sm:$0xff] }
 0x814   : > { %v1275_v28 = vmul.f32 %v1272_v26, %v1272_v26 }
 0x817   : > { %v1273_v25 = vld [vmem:[#allocation3 + $0x40] sm:$0xff] }
 0x818   : > { %v1274_v27 = vmul.f32 0.005, %v1273_v25 }
 0x81a   : > { %v1276_v29 = vsub.f32 %v1274_v27, %v1275_v28 }
 0x81c   : > { %v1277_v30 = vadd.f32 1e-05, %v1276_v29 }
 0x81e   : > { %2007 = vrsqrt.f32 %v1277_v30  ;;  %vm1284_vm0 = vweird.f32 %v1277_v30 }
 0x824   : > { %v2008_v31 = vpop.eup %2007 }
 0x825   : > { %v1279_v32 = vmul.f32 %v2008_v31, %v1277_v30  ;;  %vm1285_vm1 = vweird.f32 %v2008_v31 }
 0x826   : > { %vm1286_vm2 = vmor %vm1284_vm0, %vm1285_vm1 }
 0x827   : > { %v1280_v33 = vmul.f32 %v2008_v31, %v1279_v32 }
 0x829   : > { %v1281_v34 = vmul.f32 0.5, %v1280_v33 }
 0x82b   : > { %v1282_v35 = vsub.f32 1.5, %v1281_v34 }
 0x82d   : > { %v1283_v37 = vmul.f32 %v2008_v31, %v1282_v35 }
 0x82f   : > { %v1287_v38 = vsel %vm1286_vm2, %v2008_v31, %v1283_v37 }
 0x830   : > { %v1288_v39 = vmul.f32 %v1287_v38, %v1270_v36 }
 0x832   : > { %v1291_v40 = vmul.f32 %v1288_v39, %v1272_v26  ;;  %1290 = vst.msk [vmem:[#allocation4 + $0x40] sm:$0xff] %vm1257_vm15, %v1288_v39 }
 0x834   : > { %1293 = vrot.lane.b32.xlu0 %v1291_v40, %s2118_s29 }
 0x8a6   : > { %v1294_v41 = vpop.permute.xlu0 %1293 }
 0x8a7   : > { %v1296_v42 = vsub.f32 %v1270_v36, %v1294_v41 }
 0x8a9   : > { %1298 = vrot.lane.b32.xlu0 %v1296_v42, %s2119_s30 }
 0x91b   : > { %v1299_v43 = vpop.permute.xlu0 %1298 }
 0x91c   : > { %1302 = vst.msk [vmem:[#allocation5 + $0x40] sm:$0xff] %vm1257_vm15, %v1299_v43 }
 0x91d PF: > { %p1767_p11 = scmp.ne.s32.totalorder %s2094_s15, 3 }
 0x91e   : > { %s2762_s1 = sld [smem:[#allocation11_spill]] (!%p1767_p11) }
 0x91f   : > { %1306 = sbr.rel (%p1767_p11) target bundleno = 2863 (0xb2f), region = 100  ;;  %s2763_s2 = sld [smem:[#allocation12_spill]] (!%p1767_p11) }
 0x924   : > { %v1326_v44 = vld [vmem:[%s2251_s19 + $0x78] sm:$0xff]  ;;  %vm1327_vm3 = vcmask 211968   ;;  %v1325_v45 = vld [vmem:[%s2251_s19 + $0x70] sm:$0xff]  ;;  %v1324_v46 = vld [vmem:[%s2251_s19 + $0x68] sm:$0xff]  ;;  %v2120_v50 = vmov 0   ;;  %vm1479_vm4 = vcmask 261120  }
 0x925   : > { %1889 = vmatpush.xpose.msk.msra.mxu3 %vm1327_vm3, %v1326_v44  ;;  %1768 = vmatpush.xpose.msk.msra.mxu0 %vm1327_vm3, %v1326_v44  ;;  %v1323_v47 = vld [vmem:[%s2251_s19 + $0x60] sm:$0xff]  ;;  %v1420_v48 = vld [vmem:[#allocation4 + $0x18] sm:$0xff]  ;;  %v1321_v51 = vld [vmem:[%s2251_s19 + $0x50] sm:$0xff]  ;;  %vm1542_vm5 = vcmask 130048  }
 0x926   : > { %v1322_v49 = vld [vmem:[%s2251_s19 + $0x58] sm:$0xff]  ;;  %2009 = vset.pattern.permute.xlu0 %v2120_v50  ;;  %2010 = vset.pattern.permute.xlu1 %v2120_v50  ;;  %v1419_v52 = vld [vmem:[#allocation4 + $0x10] sm:$0xff]  ;;  %v1320_v54 = vld [vmem:[%s2251_s19 + $0x48] sm:$0xff] }
 0x927   : > { %1442 = vperm.xlu0 %2009, %v1420_v48   ;;  %2011 = vset.pattern.permute.xlu2 %v2120_v50  ;;  %v1424_v53 = vld [vmem:[#allocation5 + $0x18] sm:$0xff]  ;;  %v1319_v55 = vld [vmem:[%s2251_s19 + $0x40] sm:$0xff]  ;;  %v1422_v56 = vld [vmem:[#allocation5 + $0x8] sm:$0xff] }
 0x928   : > { %1466 = vperm.xlu1 %2010, %v1424_v53   ;;  %v1318_v57 = vld [vmem:[%s2251_s19 + $0x38] sm:$0xff]  ;;  %v1418_v58 = vld [vmem:[#allocation4 + $0x8] sm:$0xff]  ;;  %v1317_v59 = vld [vmem:[%s2251_s19 + $0x30] sm:$0xff] }
 0x929   : > { %1890 = vmatpush.xpose.msk.msra.mxu3 %vm1327_vm3, %v1325_v45  ;;  %1769 = vmatpush.xpose.msk.msra.mxu0 %vm1327_vm3, %v1325_v45  ;;  %v1510_v60 = vld [vmem:[#allocation4 + $0x20] sm:$0xff]  ;;  %v1316_v61 = vld [vmem:[%s2251_s19 + $0x28] sm:$0xff]  ;;  %v1314_v2 = vld [vmem:[%s2251_s19 + $0x18] sm:$0xff] }
 0x92a   : > { %v1421_v62 = vld [vmem:[#allocation5] sm:$0xff]  ;;  %v1514_v3 = vld [vmem:[#allocation5 + $0x28] sm:$0xff]  ;;  %v1423_v6 = vld [vmem:[#allocation5 + $0x10] sm:$0xff] }
 0x92b   : > { %v1315_v63 = vld [vmem:[%s2251_s19 + $0x20] sm:$0xff]  ;;  %v1313_v1 = vld [vmem:[%s2251_s19 + $0x10] sm:$0xff]  ;;  %1461 = vperm.xlu2 %2011, %v1423_v6   ;;  %v1312_v8 = vld [vmem:[%s2251_s19 + $0x8] sm:$0xff] }
 0x92c   : > { %v1567_v0 = vld [vmem:[#allocation4 + $0x40] sm:$0xff]  ;;  %v1308_v12 = vld [vmem:[%s2762_s1 + $0x8] sm:$0xff]  ;;  %v1309_v15 = vld [vmem:[%s2762_s1 + $0x10] sm:$0xff] }
 0x92d   : > { %1891 = vmatpush.xpose.msk.msra.mxu3 %vm1327_vm3, %v1324_v46  ;;  %1770 = vmatpush.xpose.msk.msra.mxu0 %vm1327_vm3, %v1324_v46  ;;  %v1596_v7 = vld [vmem:[#allocation6] sm:$0x1]  ;;  %v1511_v14 = vld [vmem:[#allocation4 + $0x28] sm:$0xff]  ;;  %v1310_v16 = vld [vmem:[%s2762_s1 + $0x18] sm:$0xff] }
 0x92e   : > { %v1569_v9 = vld [vmem:[#allocation5 + $0x40] sm:$0xff]  ;;  %v1478_v42 = vld [vmem:[%s2763_s2 + $0x8] sm:$0xff] }
 0x92f   : > { %1437 = vperm.xlu0 %2009, %v1419_v52   ;;  %v1417_v10 = vld [vmem:[#allocation4] sm:$0xff] }
 0x930   : > { %1432 = vperm.xlu1 %2010, %v1418_v58   ;;  %v1311_v11 = vld [vmem:[%s2251_s19] sm:$0xff] }
 0x931   : > { %1892 = vmatpush.xpose.msk.msra.mxu3 %vm1327_vm3, %v1323_v47  ;;  %1771 = vmatpush.xpose.msk.msra.mxu0 %vm1327_vm3, %v1323_v47  ;;  %v1307_v13 = vld [vmem:[%s2762_s1] sm:$0xff] }
 0x932   : > { %v1513_v5 = vld [vmem:[#allocation5 + $0x20] sm:$0xff] }
 0x933   : > { %1427 = vperm.xlu2 %2011, %v1417_v10   ;;  %v1583_v17 = vld [vmem:[%s2742_s4] sm:$0xff] }
 0x934   : > { %v1477_v41 = vld [vmem:[%s2763_s2] sm:$0xff] }
 0x935   : > { %1893 = vmatpush.xpose.msk.msra.mxu3 %vm1327_vm3, %v1322_v49  ;;  %1772 = vmatpush.xpose.msk.msra.mxu0 %vm1327_vm3, %v1322_v49 }
 0x937   : > { %1456 = vperm.xlu0 %2009, %v1422_v56  }
 0x938   : > { %1451 = vperm.xlu1 %2010, %v1421_v62  }
 0x939   : > { %1894 = vmatpush.xpose.msk.msra.mxu3 %vm1327_vm3, %v1321_v51  ;;  %1773 = vmatpush.xpose.msk.msra.mxu0 %vm1327_vm3, %v1321_v51 }
 0x93b   : > { %1522 = vperm.xlu2 %2011, %v1511_v14  }
 0x93d   : > { %1895 = vmatpush.xpose.msk.msra.mxu3 %vm1327_vm3, %v1320_v54  ;;  %1774 = vmatpush.xpose.msk.msra.mxu0 %vm1327_vm3, %v1320_v54 }
 0x93f   : > { %1517 = vperm.xlu0 %2009, %v1510_v60  }
 0x940   : > { %1534 = vperm.xlu1 %2010, %v1514_v3  }
 0x941   : > { %1896 = vmatpush.xpose.msk.msra.mxu3 %vm1327_vm3, %v1319_v55  ;;  %1775 = vmatpush.xpose.msk.msra.mxu0 %vm1327_vm3, %v1319_v55  ;;  %v1541_v55 = vld [vmem:[%s2741_s3] sm:$0xff] }
 0x943   : > { %1529 = vperm.xlu2 %2011, %v1513_v5  }
 0x945   : > { %1897 = vmatpush.xpose.msk.msra.mxu3 %vm1327_vm3, %v1318_v57  ;;  %1776 = vmatpush.xpose.msk.msra.mxu0 %vm1327_vm3, %v1318_v57 }
 0x947   : > { %1572 = vperm.xlu0 %2009, %v1567_v0  }
 0x948   : > { %1578 = vperm.xlu1 %2010, %v1569_v9  }
 0x949   : > { %1898 = vmatpush.xpose.msk.msra.mxu3 %vm1327_vm3, %v1317_v59  ;;  %1777 = vmatpush.xpose.msk.msra.mxu0 %vm1327_vm3, %v1317_v59 }
 0x94b   : > { %1586 = vperm.xlu2 %2011, %v1583_v17  }
 0x94d   : > { %1899 = vmatpush.xpose.msk.msra.mxu3 %vm1327_vm3, %v1316_v61  ;;  %1778 = vmatpush.xpose.msk.msra.mxu0 %vm1327_vm3, %v1316_v61 }
 0x94f   : > { %1599 = vperm.xlu0 %2009, %v1596_v7  }
 0x951   : > { %1900 = vmatpush.xpose.msk.msra.mxu3 %vm1327_vm3, %v1315_v63  ;;  %1779 = vmatpush.xpose.msk.msra.mxu0 %vm1327_vm3, %v1315_v63 }
 0x955   : > { %1901 = vmatpush.xpose.msk.msra.mxu3 %vm1327_vm3, %v1314_v2  ;;  %1780 = vmatpush.xpose.msk.msra.mxu0 %vm1327_vm3, %v1314_v2 }
 0x959   : > { %1902 = vmatpush.xpose.msk.msra.mxu3 %vm1327_vm3, %v1313_v1  ;;  %1781 = vmatpush.xpose.msk.msra.mxu0 %vm1327_vm3, %v1313_v1 }
 0x95d   : > { %1903 = vmatpush.xpose.msk.msra.mxu3 %vm1327_vm3, %v1312_v8  ;;  %1782 = vmatpush.xpose.msk.msra.mxu0 %vm1327_vm3, %v1312_v8 }
 0x961   : > { %1904 = vmatpush.xpose.msk.msra.mxu3 %vm1327_vm3, %v1311_v11  ;;  %1783 = vmatpush.xpose.msk.msra.mxu0 %vm1327_vm3, %v1311_v11 }
 0x964   : > { %1785 = vmatmul.msk.f32.vlgmr.msra.gmra.mxu3 %vm1327_vm3, %v1308_v12  ;;  %1784 = vmatmul.msk.f32.vlgmr.msra.gmra.mxu0 %vm1327_vm3, %v1307_v13 }
 0x96c   : > { %1786 = vmatmul.msk.f32.gmra.mxu3 %vm1327_vm3, %v1309_v15 }
 0x974   : > { %1787 = vmatmul.msk.f32.gmra.mxu3 %vm1327_vm3, %v1310_v16 }
 0x985   : > { %v1462_v21 = vpop.permute.xlu2 %1461 }
 0x98d   : > { %v1428_v29 = vpop.permute.xlu2 %1427 }
 0x995   : > { %v1523_v43 = vpop.permute.xlu2 %1522 }
 0x999   : > { %v1443_v18 = vpop.permute.xlu0 %1442 }
 0x99a   : > { %v1467_v20 = vpop.permute.xlu1 %1466 }
 0x99d   : > { %v1530_v50 = vpop.permute.xlu2 %1529 }
 0x9a1   : > { %v1438_v4 = vpop.permute.xlu0 %1437 }
 0x9a2   : > { %v1433_v23 = vpop.permute.xlu1 %1432 }
 0x9a5   : > { %v1587_v62 = vpop.permute.xlu2 %1586 }
 0x9a9   : > { %v1457_v33 = vpop.permute.xlu0 %1456 }
 0x9aa   : > { %v1452_v36 = vpop.permute.xlu1 %1451 }
 0x9b1   : > { %v1518_v45 = vpop.permute.xlu0 %1517 }
 0x9b2   : > { %v1535_v49 = vpop.permute.xlu1 %1534 }
 0x9b9   : > { %v1573_v56 = vpop.permute.xlu0 %1572 }
 0x9ba   : > { %v1579_v59 = vpop.permute.xlu1 %1578 }
 0x9c1   : > { %v1600_v1 = vpop.permute.xlu0 %1599 }
 0x9c2   : > { %v1602_v8 = vperm.slane %v1600_v1, 0 }
 0x9e1   : > { %v1405_v25 = vpop.f32.mrf.mxu0 }
 0x9e2   : > { %v1445_v30 = vmul.f32 %v1428_v29, %v1405_v25 }
 0x9e4   : > { %v1469_v38 = vadd.f32 %v1452_v36, %v1445_v30 }
 0x9e6   : > { %v1473_v40 = vmax.f32 %v1469_v38, 0.0 }
 0x9e7   : > { %v1408_v19 = vpop.f32.mrf.mxu3 }
 0x9e8   : > { %v1446_v27 = vmul.f32 %v1433_v23, %v1408_v19 }
 0x9ea   : > { %v1470_v35 = vadd.f32 %v1457_v33, %v1446_v27 }
 0x9ec   : > { %v1474_v39 = vmax.f32 %v1470_v35, 0.0 }
 0x9ef   : > { %v1411_v22 = vpop.f32.mrf.mxu3 }
 0x9f0   : > { %v1447_v24 = vmul.f32 %v1438_v4, %v1411_v22 }
 0x9f2   : > { %v1471_v32 = vadd.f32 %v1462_v21, %v1447_v24 }
 0x9f4   : > { %v1475_v37 = vmax.f32 %v1471_v32, 0.0 }
 0x9f7   : > { %v1414_v26 = vpop.f32.mrf.mxu3 }
 0x9f8   : > { %v1448_v28 = vmul.f32 %v1443_v18, %v1414_v26 }
 0x9fa   : > { %v1472_v31 = vadd.f32 %v1467_v20, %v1448_v28 }
 0x9fc   : > { %v1476_v34 = vmax.f32 %v1472_v31, 0.0 }
 0x9fe   : > { %1498 = vmatpush.msra.mxu1 %v1476_v34 }
 0xa00   : > { %1499 = vmatpush.msra.mxu1 %v1475_v37 }
 0xa02   : > { %1500 = vmatpush.msra.mxu1 %v1474_v39 }
 0xa04   : > { %1501 = vmatpush.msra.mxu1 %v1473_v40 }
 0xa05   : > { %1788 = vmatmul.msk.f32.vlgmr.msra.gmra.mxu1 %vm1479_vm4, %v1477_v41 }
 0xa0d   : > { %1789 = vmatmul.msk.f32.gmra.mxu1 %vm1479_vm4, %v1478_v42 }
 0xa82   : > { %v1503_v44 = vpop.f32.mrf.mxu1 }
 0xa83   : > { %v1525_v46 = vmul.f32 %v1518_v45, %v1503_v44 }
 0xa85   : > { %v1537_v52 = vadd.f32 %v1530_v50, %v1525_v46 }
 0xa87   : > { %v1539_v54 = vmax.f32 %v1537_v52, 0.0 }
 0xa8a   : > { %v1506_v47 = vpop.f32.mrf.mxu1 }
 0xa8b   : > { %v1526_v48 = vmul.f32 %v1523_v43, %v1506_v47 }
 0xa8d   : > { %v1538_v51 = vadd.f32 %v1535_v49, %v1526_v48 }
 0xa8f   : > { %v1540_v53 = vmax.f32 %v1538_v51, 0.0 }
 0xa91   : > { %1560 = vmatpush.msra.mxu2 %v1540_v53 }
 0xa93   : > { %1561 = vmatpush.msra.mxu2 %v1539_v54 }
 0xa94   : > { %1790 = vmatmul.msk.f32.vlgmr.msra.gmra.mxu2 %vm1542_vm5, %v1541_v55 }
 0xb17   : > { %v1563_v57 = vpop.f32.mrf.mxu2 }
 0xb18   : > { %v1575_v58 = vmul.f32 %v1573_v56, %v1563_v57 }
 0xb1a   : > { %v1581_v60 = vadd.f32 %v1579_v59, %v1575_v58 }
 0xb1c   : > { %v1582_v61 = vmax.f32 %v1581_v60, 0.0 }
 0xb1e   : > { %v1589_v63 = vmul.f32 %v1587_v62, %v1582_v61 }
 0xb20   : > { %v1590_v0 = vrot.slane %v1589_v63, 4 }
 0xb22   : > { %v1591_v2 = vadd.f32 %v1590_v0, %v1589_v63 }
 0xb24   : > { %v1592_v3 = vrot.slane %v1591_v2, 2 }
 0xb26   : > { %v1593_v6 = vadd.f32 %v1592_v3, %v1591_v2 }
 0xb28   : > { %v1594_v7 = vrot.slane %v1593_v6, 1 }
 0xb2a   : > { %v1595_v9 = vadd.f32 %v1594_v7, %v1593_v6 }
 0xb2c   : > { %v1603_v10 = vadd.f32 %v1602_v8, %v1595_v9 }
 0xb2e   : > { %1604 = vst [vmem:[%s2256_s22] sm:$0x1] %v1603_v10 }
 0xb2f PF: > { %s1614_s29 = scalar_lea.hbm %s2747_s9, %s2090_s14  ;;  %s1616_s30 = sshll.u32 %s2256_s22, 4  ;;  %s1617_s30 = int_to_ptr.vmem [resolvable:$true] %s1616_s30 }
 0xb30   : > { %s1618_s15 = sshll.u32 %s1614_s29, 4  ;;  %s2764_s10 = sand.u32 1, %s2082_s12   ;;  %s1619_s15 = int_to_ptr.hbm [resolvable:$true] %s1618_s15 }
 0xb31   : > { %s1606_s8 = scalar_lea.sflag [#allocation8], %s2764_s10  ;;  %s2026_s0 = sshra.s32 %s1619_s15, 4  ;;  %s2027_s0 = int_to_ptr.hbm [resolvable:$true] %s2026_s0 }
 0xb32   : > { %s2028_s19 = scalar_lea.hbm %s2027_s0, 1  ;;  %s2032_s23 = scalar_lea.hbm %s2747_s9, 2 }
 0xb33   : > { %p2029_p12 = scmp.ne.s32.totalorder %s2027_s0, %s2028_s19  ;;  %p2033_p1 = scmp.lt.s32.totalorder %s2027_s0, %s2747_s9 }
 0xb34   : > { %p2034_p2 = scmp.lt.s32.totalorder %s2032_s23, %s2028_s19 }
 0xb35   : > { %p2030_p13 = pnand %p2029_p12, %p2226_p3 }
 0xb36   : > { %p2035_p4 = por %p2034_p2, %p2033_p1 }
 0xb37   : > { %p2031_p0 = pneg %p2030_p13 }
 0xb39   : > { %p2036_p5 = pnand %p2035_p4, %p2031_p0 }
 0xb3b   : > { %2039 = shalt.err (!%p2036_p5)
}
 0xb3c   : > { %1905 = dma.vmem_to_hbm [thread:$0]  (%p2226_p3), %s1617_s30, 16, %s1619_s15, %s1606_s8  }
 0xb3d PF: > { %p1911_p6 = scmp.ge.s32.totalorder %s2106_s18, 2  ;;  %s1630_s14 = sand.u32 1, %s2078_s11  }
 0xb3e   : > { %s1631_s1 = scalar_lea.sflag [#allocation8], %s1630_s14 }
 0xb3f   : > { %p1908_p7 = pnand %p1911_p6, %p2237_p8 }
 0xb41   : > { %p1909_p9 = pneg %p1908_p7 }
 0xb43   : > { %2073 = dma.done.wait (%p1909_p9), %s1631_s1, 16  }
 0xb44   : > { %2075 = vsyncadd (%p1909_p9), %s1631_s1, 4294967280  ;;  %s24_s18 = sadd.s32 1, %s2106_s18   ;;  %s2765_s11 = smov %s2082_s12 }
 0xb45   : > { %p21_p10 = scmp.ge.s32.totalorder %s24_s18, 10   ;;  %s2766_s12 = smov %s2086_s13 }
 0xb46   : > { %s2767_s13 = smov %s2235_s25  ;;  %s2768_s14 = smov %s2098_s16 }
 0xb47   : > { %s2769_s15 = smov %s2102_s17  ;;  %s2770_s16 = smov %s2773_s20 }
 0xb48   : > { %s2771_s17 = smov %s2777_s21  ;;  %23 = sbr.rel (!%p21_p10) target bundleno = 9 (0x9), region = 153 }
 0xb4d   :  { %1636 = vsyncpa [#allocation8], 1 }
 0xb4e   :  { %1638 = vsyncpa [#allocation8 + $0x1], 1 }

</bundles_post_ra>
